<compile_context>
chip_gen: v7x
topology: tpu7x:2x2x1
jax: 0.10.0
libtpu: 0.0.40
codegen_flags: <defaults>
</compile_context>

<pallas_src>
import functools

import jax
import jax.numpy as jnp
from jax import lax
from jax.experimental import pallas as pl
from jax.experimental.pallas import tpu as pltpu


def _layernorm(x, w, b, eps=1e-5):
    mu = jnp.mean(x, axis=-1, keepdims=True)
    xc = x - mu
    var = jnp.mean(xc * xc, axis=-1, keepdims=True)
    return xc * lax.rsqrt(var + eps) * w + b


def sas4rec_encoder_kernel(
        x_ref,
        wq_ref, bq_ref, wk_ref, bk_ref, wv_ref, bv_ref, wo_ref, bo_ref,
        n1w_ref, n1b_ref, l1w_ref, l1b_ref, l2w_ref, l2b_ref, n2w_ref, n2b_ref,
        nfw_ref, nfb_ref,
        out_ref,
        *, num_layers, num_heads, activation):
    """Full TransformerEncoder for one batch element (block (1, T, D))."""
    x = x_ref[0]                           # (T, D)
    T, D = x.shape
    hd = D // num_heads
    scale = float(hd) ** -0.5

    # Causal mask (True = may attend), built once per batch block.
    row = lax.broadcasted_iota(jnp.int32, (T, T), 0)
    col = lax.broadcasted_iota(jnp.int32, (T, T), 1)
    allowed = col <= row

    for l in range(num_layers):            # static unroll: all layers stay in VMEM
        # ---- multi-head self attention (PyTorch nn.MultiheadAttention math) ----
        q = jnp.dot(x, wq_ref[l], preferred_element_type=jnp.float32) + bq_ref[l]
        k = jnp.dot(x, wk_ref[l], preferred_element_type=jnp.float32) + bk_ref[l]
        v = jnp.dot(x, wv_ref[l], preferred_element_type=jnp.float32) + bv_ref[l]

        # Static per-head loop (num_heads is tiny here); each head is plain 2-D
        # MXU work with no in-kernel 3-D transposes.  At production head counts
        # use a leading-batch einsum instead.
        head_outs = []
        for h in range(num_heads):
            q_h = q[:, h * hd:(h + 1) * hd]            # (T, hd), static slice
            k_h = k[:, h * hd:(h + 1) * hd]
            v_h = v[:, h * hd:(h + 1) * hd]
            # q_h @ k_h^T without materializing the transpose.
            s = lax.dot_general(q_h, k_h, (((1,), (1,)), ((), ())),
                                preferred_element_type=jnp.float32) * scale
            s = jnp.where(allowed, s, -1e30)
            m = jnp.max(s, axis=-1, keepdims=True)
            p = jnp.exp(s - m)
            p = p / jnp.sum(p, axis=-1, keepdims=True)
            head_outs.append(
                jnp.dot(p, v_h, preferred_element_type=jnp.float32))
        a = jnp.concatenate(head_outs, axis=-1)        # (T, D)
        a = jnp.dot(a, wo_ref[l], preferred_element_type=jnp.float32) + bo_ref[l]
        # TODO(synk): dropout (attention / residual / FFN) is a no-op in eval mode
        # and is omitted.
        x = _layernorm(x + a, n1w_ref[l], n1b_ref[l])

        # ---- feed-forward ----
        h_ff = jnp.dot(x, l1w_ref[l], preferred_element_type=jnp.float32) + l1b_ref[l]
        if activation == "relu":
            h_ff = jnp.maximum(h_ff, 0.0)
        else:  # "gelu"
            h_ff = jax.nn.gelu(h_ff, approximate=False)
        y = jnp.dot(h_ff, l2w_ref[l], preferred_element_type=jnp.float32) + l2b_ref[l]
        x = _layernorm(x + y, n2w_ref[l], n2b_ref[l])

    # Final LayerNorm applied by nn.TransformerEncoder(norm=...).
    x = _layernorm(x, nfw_ref[...], nfb_ref[...])
    out_ref[0] = x.astype(out_ref.dtype)


def sas4rec_encoder_pallas(x_emb, enc_params, *, num_heads, activation):
    """x_emb: (B, T, D) f32 embedded sequence (item + positional)."""
    B, T, D = x_emb.shape
    L = enc_params[0].shape[0]

    def bcast_spec(arr):
        n = arr.ndim
        return pl.BlockSpec(arr.shape, lambda b, _n=n: (0,) * _n)

    in_specs = [pl.BlockSpec((1, T, D), lambda b: (b, 0, 0))]
    in_specs += [bcast_spec(a) for a in enc_params]
    out_spec = pl.BlockSpec((1, T, D), lambda b: (b, 0, 0))

    kernel = functools.partial(
        sas4rec_encoder_kernel,
        num_layers=L, num_heads=num_heads, activation=activation)

    return pl.pallas_call(
        kernel,
        out_shape=jax.ShapeDtypeStruct((B, T, D), jnp.float32),
        grid=(B,),
        in_specs=in_specs,
        out_specs=out_spec,
        compiler_params=pltpu.CompilerParams(
            dimension_semantics=("parallel",)),
    )(x_emb, *enc_params)


def pack_encoder_params(layer_params, final_norm, state_size):
    """Convert PyTorch-layout encoder weights to the kernel layout.

    Done ONCE outside the hot path: transposed to (in, out), Q/K/V split, biases
    and norm params reshaped to (1, dim), all stacked over layers.
    """
    D = state_size
    cols = [[] for _ in range(16)]
    for (in_w, in_b, out_w, out_b, n1w, n1b,
         l1w, l1b, l2w, l2b, n2w, n2b) in layer_params:
        vals = [
            in_w[:D].T,          in_b[:D].reshape(1, D),
            in_w[D:2 * D].T,     in_b[D:2 * D].reshape(1, D),
            in_w[2 * D:].T,      in_b[2 * D:].reshape(1, D),
            out_w.T,             out_b.reshape(1, D),
            n1w.reshape(1, D),   n1b.reshape(1, D),
            l1w.T,               l1b.reshape(1, -1),
            l2w.T,               l2b.reshape(1, D),
            n2w.reshape(1, D),   n2b.reshape(1, D),
        ]
        for c, v in zip(cols, vals):
            c.append(jnp.asarray(v, jnp.float32))
    stacked = tuple(jnp.stack(c, axis=0) for c in cols)
    nfw = jnp.asarray(final_norm[0], jnp.float32).reshape(1, D)
    nfb = jnp.asarray(final_norm[1], jnp.float32).reshape(1, D)
    return stacked + (nfw, nfb)


def sas4rec_forward(x_ids, item_emb, pos_emb, enc_params, *, num_heads,
                    activation="relu", shrink=False, return_all=False):
    """x_ids: (B, T) int32 item ids.  Returns out[:, -1, :] (or full out)."""
    B, T = x_ids.shape
    seqs = jnp.take(item_emb, x_ids, axis=0)                     # gather glue in JAX
    if shrink:
        seqs = seqs * (item_emb.shape[1] ** 0.5)
    seqs = seqs + jnp.take(pos_emb, jnp.arange(T), axis=0)[None, :, :]
    out = sas4rec_encoder_pallas(seqs.astype(jnp.float32), enc_params,
                                 num_heads=num_heads, activation=activation)
    return out if return_all else out[:, -1, :]


# ------------------------- pure-JAX reference --------------------------------
def sas4rec_reference(x_ids, item_emb, pos_emb, layer_params, final_norm, *,
                      num_heads, activation="relu", shrink=False):
    B, T = x_ids.shape
    D = item_emb.shape[1]
    hd = D // num_heads
    hp = lax.Precision.HIGHEST
    x = jnp.take(item_emb, x_ids, axis=0)
    if shrink:
        x = x * (D ** 0.5)
    x = x + jnp.take(pos_emb, jnp.arange(T), axis=0)[None]
    allowed = jnp.tril(jnp.ones((T, T), bool))

    def layernorm(v, w, b, eps=1e-5):
        mu = v.mean(-1, keepdims=True)
        vc = v - mu
        var = (vc * vc).mean(-1, keepdims=True)
        return vc / jnp.sqrt(var + eps) * w + b

    for (in_w, in_b, out_w, out_b, n1w, n1b,
         l1w, l1b, l2w, l2b, n2w, n2b) in layer_params:
        q = jnp.einsum('btd,ed->bte', x, in_w[:D], precision=hp) + in_b[:D]
        k = jnp.einsum('btd,ed->bte', x, in_w[D:2 * D], precision=hp) + in_b[D:2 * D]
        v = jnp.einsum('btd,ed->bte', x, in_w[2 * D:], precision=hp) + in_b[2 * D:]
        qh = q.reshape(B, T, num_heads, hd)
        kh = k.reshape(B, T, num_heads, hd)
        vh = v.reshape(B, T, num_heads, hd)
        s = jnp.einsum('bqhd,bkhd->bhqk', qh, kh, precision=hp) * (hd ** -0.5)
        s = jnp.where(allowed[None, None], s, -1e30)
        p = jax.nn.softmax(s, axis=-1)
        a = jnp.einsum('bhqk,bkhd->bqhd', p, vh, precision=hp).reshape(B, T, D)
        a = jnp.einsum('btd,ed->bte', a, out_w, precision=hp) + out_b
        x = layernorm(x + a, n1w, n1b)
        h = jnp.einsum('btd,fd->btf', x, l1w, precision=hp) + l1b
        h = jnp.maximum(h, 0.0) if activation == "relu" else jax.nn.gelu(h, approximate=False)
        y = jnp.einsum('btf,df->btd', h, l2w, precision=hp) + l2b
        x = layernorm(x + y, n2w, n2b)
    x = layernorm(x, final_norm[0], final_norm[1])
    return x[:, -1, :]


if __name__ == "__main__":
    # Module hyper-params (small, consistent with SAS4Rec.__init__).
    input_size = 50          # vocab size (embedding has input_size + 1 rows)
    state_size = 32          # d_model
    max_len = 8              # sequence length
    num_layers = 2
    num_heads = 2
    dim_feedforward = 64
    activation = "relu"
    batch = 2

    key = jax.random.PRNGKey(0)
    k_item, k_pos, k_ids, k_w = jax.random.split(key, 4)

    item_emb = 0.1 * jax.random.normal(k_item, (input_size + 1, state_size), jnp.float32)
    item_emb = item_emb.at[input_size].set(0.0)      # padding_idx row is zero
    pos_emb = 0.1 * jax.random.normal(k_pos, (max_len, state_size), jnp.float32)

    scale = 1.0 / jnp.sqrt(jnp.float32(state_size))
    layer_params = []
    for _ in range(num_layers):
        k_w, *ks = jax.random.split(k_w, 13)
        in_w = jax.random.uniform(ks[0], (3 * state_size, state_size), jnp.float32, -scale, scale)
        in_b = jax.random.uniform(ks[1], (3 * state_size,), jnp.float32, -scale, scale)
        out_w = jax.random.uniform(ks[2], (state_size, state_size), jnp.float32, -scale, scale)
        out_b = jax.random.uniform(ks[3], (state_size,), jnp.float32, -scale, scale)
        n1w = 1.0 + 0.01 * jax.random.normal(ks[4], (state_size,), jnp.float32)
        n1b = 0.01 * jax.random.normal(ks[5], (state_size,), jnp.float32)
        l1w = jax.random.uniform(ks[6], (dim_feedforward, state_size), jnp.float32, -scale, scale)
        l1b = jax.random.uniform(ks[7], (dim_feedforward,), jnp.float32, -scale, scale)
        l2w = jax.random.uniform(ks[8], (state_size, dim_feedforward), jnp.float32, -scale, scale)
        l2b = jax.random.uniform(ks[9], (state_size,), jnp.float32, -scale, scale)
        n2w = 1.0 + 0.01 * jax.random.normal(ks[10], (state_size,), jnp.float32)
        n2b = 0.01 * jax.random.normal(ks[11], (state_size,), jnp.float32)
        layer_params.append((in_w, in_b, out_w, out_b, n1w, n1b,
                             l1w, l1b, l2w, l2b, n2w, n2b))

    k_w, kf1, kf2 = jax.random.split(k_w, 3)
    final_norm = (1.0 + 0.01 * jax.random.normal(kf1, (state_size,), jnp.float32),
                  0.01 * jax.random.normal(kf2, (state_size,), jnp.float32))

    x_ids = jax.random.randint(k_ids, (batch, max_len), 0, input_size + 1, jnp.int32)

    enc_params = pack_encoder_params(layer_params, final_norm, state_size)
    out = sas4rec_forward(x_ids, item_emb, pos_emb, enc_params,
                          num_heads=num_heads, activation=activation)
    out = jax.block_until_ready(out)

    ref = sas4rec_reference(x_ids, item_emb, pos_emb, layer_params, final_norm,
                            num_heads=num_heads, activation=activation)
    assert out.shape == (batch, state_size), out.shape
    max_err = float(jnp.max(jnp.abs(out - ref)))
    assert jnp.allclose(out, ref, atol=2e-4, rtol=2e-4), max_err

    print("KERNEL_OK")
</pallas_src>

<mosaic_0001>
module attributes {stable_mosaic.version = 11 : i64} {
  func.func @sas4rec_encoder_kernel(%arg0: i32, %arg1: memref<1x8x32xf32, #tpu.memory_space<vmem>>, %arg2: memref<2x32x32xf32, #tpu.memory_space<vmem>>, %arg3: memref<2x1x32xf32, #tpu.memory_space<vmem>>, %arg4: memref<2x32x32xf32, #tpu.memory_space<vmem>>, %arg5: memref<2x1x32xf32, #tpu.memory_space<vmem>>, %arg6: memref<2x32x32xf32, #tpu.memory_space<vmem>>, %arg7: memref<2x1x32xf32, #tpu.memory_space<vmem>>, %arg8: memref<2x32x32xf32, #tpu.memory_space<vmem>>, %arg9: memref<2x1x32xf32, #tpu.memory_space<vmem>>, %arg10: memref<2x1x32xf32, #tpu.memory_space<vmem>>, %arg11: memref<2x1x32xf32, #tpu.memory_space<vmem>>, %arg12: memref<2x32x64xf32, #tpu.memory_space<vmem>>, %arg13: memref<2x1x64xf32, #tpu.memory_space<vmem>>, %arg14: memref<2x64x32xf32, #tpu.memory_space<vmem>>, %arg15: memref<2x1x32xf32, #tpu.memory_space<vmem>>, %arg16: memref<2x1x32xf32, #tpu.memory_space<vmem>>, %arg17: memref<2x1x32xf32, #tpu.memory_space<vmem>>, %arg18: memref<1x32xf32, #tpu.memory_space<vmem>>, %arg19: memref<1x32xf32, #tpu.memory_space<vmem>>, %arg20: memref<1x8x32xf32, #tpu.memory_space<vmem>>) attributes {dimension_semantics = [#tpu.dimension_semantics<parallel>], iteration_bounds = array<i64: 2>, scalar_prefetch = 0 : i64, scratch_operands = 0 : i64, tpu.core_type = #tpu.core_type<tc>, window_params = [{transform_indices = @transform_0, window_bounds = array<i64: 1, 8, 32>}, {pipeline_mode = #tpu.pipeline_mode<synchronous>, transform_indices = @transform_1, window_bounds = array<i64: 2, 32, 32>}, {pipeline_mode = #tpu.pipeline_mode<synchronous>, transform_indices = @transform_2, window_bounds = array<i64: 2, 1, 32>}, {pipeline_mode = #tpu.pipeline_mode<synchronous>, transform_indices = @transform_3, window_bounds = array<i64: 2, 32, 32>}, {pipeline_mode = #tpu.pipeline_mode<synchronous>, transform_indices = @transform_4, window_bounds = array<i64: 2, 1, 32>}, {pipeline_mode = #tpu.pipeline_mode<synchronous>, transform_indices = @transform_5, window_bounds = array<i64: 2, 32, 32>}, {pipeline_mode = #tpu.pipeline_mode<synchronous>, transform_indices = @transform_6, window_bounds = array<i64: 2, 1, 32>}, {pipeline_mode = #tpu.pipeline_mode<synchronous>, transform_indices = @transform_7, window_bounds = array<i64: 2, 32, 32>}, {pipeline_mode = #tpu.pipeline_mode<synchronous>, transform_indices = @transform_8, window_bounds = array<i64: 2, 1, 32>}, {pipeline_mode = #tpu.pipeline_mode<synchronous>, transform_indices = @transform_9, window_bounds = array<i64: 2, 1, 32>}, {pipeline_mode = #tpu.pipeline_mode<synchronous>, transform_indices = @transform_10, window_bounds = array<i64: 2, 1, 32>}, {pipeline_mode = #tpu.pipeline_mode<synchronous>, transform_indices = @transform_11, window_bounds = array<i64: 2, 32, 64>}, {pipeline_mode = #tpu.pipeline_mode<synchronous>, transform_indices = @transform_12, window_bounds = array<i64: 2, 1, 64>}, {pipeline_mode = #tpu.pipeline_mode<synchronous>, transform_indices = @transform_13, window_bounds = array<i64: 2, 64, 32>}, {pipeline_mode = #tpu.pipeline_mode<synchronous>, transform_indices = @transform_14, window_bounds = array<i64: 2, 1, 32>}, {pipeline_mode = #tpu.pipeline_mode<synchronous>, transform_indices = @transform_15, window_bounds = array<i64: 2, 1, 32>}, {pipeline_mode = #tpu.pipeline_mode<synchronous>, transform_indices = @transform_16, window_bounds = array<i64: 2, 1, 32>}, {pipeline_mode = #tpu.pipeline_mode<synchronous>, transform_indices = @transform_17, window_bounds = array<i64: 1, 32>}, {pipeline_mode = #tpu.pipeline_mode<synchronous>, transform_indices = @transform_18, window_bounds = array<i64: 1, 32>}, {transform_indices = @transform_19, window_bounds = array<i64: 1, 8, 32>}]} {
    %c0 = arith.constant 0 : index
    %c0_0 = arith.constant 0 : index
    %c0_1 = arith.constant 0 : index
    %0 = vector.load %arg1[%c0, %c0_0, %c0_1] : memref<1x8x32xf32, #tpu.memory_space<vmem>>, vector<1x8x32xf32>
    %1 = vector.shape_cast %0 : vector<1x8x32xf32> to vector<8x32xf32>
    %2 = tpu.iota {dimensions = array<i32: 0>} : vector<8x8xi32>
    %3 = tpu.iota {dimensions = array<i32: 1>} : vector<8x8xi32>
    %4 = arith.cmpi sle, %3, %2 : vector<8x8xi32>
    %c0_2 = arith.constant 0 : index
    %c0_3 = arith.constant 0 : index
    %c0_4 = arith.constant 0 : index
    %5 = vector.load %arg2[%c0_2, %c0_3, %c0_4] : memref<2x32x32xf32, #tpu.memory_space<vmem>>, vector<1x32x32xf32>
    %6 = vector.shape_cast %5 : vector<1x32x32xf32> to vector<32x32xf32>
    %cst = arith.constant dense<0.000000e+00> : vector<8x32xf32>
    %7 = tpu.matmul %1, %6, %cst {dimension_numbers = #tpu.dot_dimension_numbers<[1], [0], [0], [1], [0, 0, 1, 1], [], []>} : vector<8x32xf32>, vector<32x32xf32>, vector<8x32xf32> -> vector<8x32xf32>
    %c0_5 = arith.constant 0 : index
    %c0_6 = arith.constant 0 : index
    %c0_7 = arith.constant 0 : index
    %8 = vector.load %arg3[%c0_5, %c0_6, %c0_7] : memref<2x1x32xf32, #tpu.memory_space<vmem>>, vector<1x1x32xf32>
    %9 = vector.shape_cast %8 : vector<1x1x32xf32> to vector<1x32xf32>
    %10 = vector.broadcast %9 : vector<1x32xf32> to vector<8x32xf32>
    %11 = arith.addf %7, %10 : vector<8x32xf32>
    %c0_8 = arith.constant 0 : index
    %c0_9 = arith.constant 0 : index
    %c0_10 = arith.constant 0 : index
    %12 = vector.load %arg4[%c0_8, %c0_9, %c0_10] : memref<2x32x32xf32, #tpu.memory_space<vmem>>, vector<1x32x32xf32>
    %13 = vector.shape_cast %12 : vector<1x32x32xf32> to vector<32x32xf32>
    %cst_11 = arith.constant dense<0.000000e+00> : vector<8x32xf32>
    %14 = tpu.matmul %1, %13, %cst_11 {dimension_numbers = #tpu.dot_dimension_numbers<[1], [0], [0], [1], [0, 0, 1, 1], [], []>} : vector<8x32xf32>, vector<32x32xf32>, vector<8x32xf32> -> vector<8x32xf32>
    %c0_12 = arith.constant 0 : index
    %c0_13 = arith.constant 0 : index
    %c0_14 = arith.constant 0 : index
    %15 = vector.load %arg5[%c0_12, %c0_13, %c0_14] : memref<2x1x32xf32, #tpu.memory_space<vmem>>, vector<1x1x32xf32>
    %16 = vector.shape_cast %15 : vector<1x1x32xf32> to vector<1x32xf32>
    %17 = vector.broadcast %16 : vector<1x32xf32> to vector<8x32xf32>
    %18 = arith.addf %14, %17 : vector<8x32xf32>
    %c0_15 = arith.constant 0 : index
    %c0_16 = arith.constant 0 : index
    %c0_17 = arith.constant 0 : index
    %19 = vector.load %arg6[%c0_15, %c0_16, %c0_17] : memref<2x32x32xf32, #tpu.memory_space<vmem>>, vector<1x32x32xf32>
    %20 = vector.shape_cast %19 : vector<1x32x32xf32> to vector<32x32xf32>
    %cst_18 = arith.constant dense<0.000000e+00> : vector<8x32xf32>
    %21 = tpu.matmul %1, %20, %cst_18 {dimension_numbers = #tpu.dot_dimension_numbers<[1], [0], [0], [1], [0, 0, 1, 1], [], []>} : vector<8x32xf32>, vector<32x32xf32>, vector<8x32xf32> -> vector<8x32xf32>
    %c0_19 = arith.constant 0 : index
    %c0_20 = arith.constant 0 : index
    %c0_21 = arith.constant 0 : index
    %22 = vector.load %arg7[%c0_19, %c0_20, %c0_21] : memref<2x1x32xf32, #tpu.memory_space<vmem>>, vector<1x1x32xf32>
    %23 = vector.shape_cast %22 : vector<1x1x32xf32> to vector<1x32xf32>
    %24 = vector.broadcast %23 : vector<1x32xf32> to vector<8x32xf32>
    %25 = arith.addf %21, %24 : vector<8x32xf32>
    %26 = vector.extract_strided_slice %11 {offsets = [0, 0], sizes = [8, 16], strides = [1, 1]} : vector<8x32xf32> to vector<8x16xf32>
    %27 = vector.extract_strided_slice %18 {offsets = [0, 0], sizes = [8, 16], strides = [1, 1]} : vector<8x32xf32> to vector<8x16xf32>
    %28 = vector.extract_strided_slice %25 {offsets = [0, 0], sizes = [8, 16], strides = [1, 1]} : vector<8x32xf32> to vector<8x16xf32>
    %cst_22 = arith.constant dense<0.000000e+00> : vector<8x8xf32>
    %29 = tpu.matmul %26, %27, %cst_22 {dimension_numbers = #tpu.dot_dimension_numbers<[1], [1], [0], [0], [0, 0, 1, 0], [], []>} : vector<8x16xf32>, vector<8x16xf32>, vector<8x8xf32> -> vector<8x8xf32>
    %cst_23 = arith.constant 2.500000e-01 : f32
    %30 = vector.broadcast %cst_23 : f32 to vector<8x8xf32>
    %31 = arith.mulf %29, %30 : vector<8x8xf32>
    %cst_24 = arith.constant -1.000000e+30 : f32
    %32 = vector.broadcast %cst_24 : f32 to vector<8x8xf32>
    %33 = arith.select %4, %31, %32 : vector<8x8xi1>, vector<8x8xf32>
    %cst_25 = arith.constant dense<0xFF800000> : vector<8xf32>
    %34 = vector.multi_reduction <maximumf>, %33, %cst_25 [1] : vector<8x8xf32> to vector<8xf32>
    %35 = vector.shape_cast %34 : vector<8xf32> to vector<8x1xf32>
    %36 = vector.broadcast %35 : vector<8x1xf32> to vector<8x8xf32>
    %37 = arith.subf %33, %36 : vector<8x8xf32>
    %38 = math.exp %37 : vector<8x8xf32>
    %cst_26 = arith.constant dense<0.000000e+00> : vector<8xf32>
    %39 = vector.multi_reduction <add>, %38, %cst_26 [1] : vector<8x8xf32> to vector<8xf32>
    %40 = vector.shape_cast %39 : vector<8xf32> to vector<8x1xf32>
    %41 = vector.broadcast %40 : vector<8x1xf32> to vector<8x8xf32>
    %42 = arith.divf %38, %41 : vector<8x8xf32>
    %cst_27 = arith.constant dense<0.000000e+00> : vector<8x16xf32>
    %43 = tpu.matmul %42, %28, %cst_27 {dimension_numbers = #tpu.dot_dimension_numbers<[1], [0], [0], [1], [0, 0, 1, 1], [], []>} : vector<8x8xf32>, vector<8x16xf32>, vector<8x16xf32> -> vector<8x16xf32>
    %44 = vector.extract_strided_slice %11 {offsets = [0, 16], sizes = [8, 16], strides = [1, 1]} : vector<8x32xf32> to vector<8x16xf32>
    %45 = vector.extract_strided_slice %18 {offsets = [0, 16], sizes = [8, 16], strides = [1, 1]} : vector<8x32xf32> to vector<8x16xf32>
    %46 = vector.extract_strided_slice %25 {offsets = [0, 16], sizes = [8, 16], strides = [1, 1]} : vector<8x32xf32> to vector<8x16xf32>
    %cst_28 = arith.constant dense<0.000000e+00> : vector<8x8xf32>
    %47 = tpu.matmul %44, %45, %cst_28 {dimension_numbers = #tpu.dot_dimension_numbers<[1], [1], [0], [0], [0, 0, 1, 0], [], []>} : vector<8x16xf32>, vector<8x16xf32>, vector<8x8xf32> -> vector<8x8xf32>
    %cst_29 = arith.constant 2.500000e-01 : f32
    %48 = vector.broadcast %cst_29 : f32 to vector<8x8xf32>
    %49 = arith.mulf %47, %48 : vector<8x8xf32>
    %cst_30 = arith.constant -1.000000e+30 : f32
    %50 = vector.broadcast %cst_30 : f32 to vector<8x8xf32>
    %51 = arith.select %4, %49, %50 : vector<8x8xi1>, vector<8x8xf32>
    %cst_31 = arith.constant dense<0xFF800000> : vector<8xf32>
    %52 = vector.multi_reduction <maximumf>, %51, %cst_31 [1] : vector<8x8xf32> to vector<8xf32>
    %53 = vector.shape_cast %52 : vector<8xf32> to vector<8x1xf32>
    %54 = vector.broadcast %53 : vector<8x1xf32> to vector<8x8xf32>
    %55 = arith.subf %51, %54 : vector<8x8xf32>
    %56 = math.exp %55 : vector<8x8xf32>
    %cst_32 = arith.constant dense<0.000000e+00> : vector<8xf32>
    %57 = vector.multi_reduction <add>, %56, %cst_32 [1] : vector<8x8xf32> to vector<8xf32>
    %58 = vector.shape_cast %57 : vector<8xf32> to vector<8x1xf32>
    %59 = vector.broadcast %58 : vector<8x1xf32> to vector<8x8xf32>
    %60 = arith.divf %56, %59 : vector<8x8xf32>
    %cst_33 = arith.constant dense<0.000000e+00> : vector<8x16xf32>
    %61 = tpu.matmul %60, %46, %cst_33 {dimension_numbers = #tpu.dot_dimension_numbers<[1], [0], [0], [1], [0, 0, 1, 1], [], []>} : vector<8x8xf32>, vector<8x16xf32>, vector<8x16xf32> -> vector<8x16xf32>
    %62 = tpu.concatenate %43, %61 in 1 : vector<8x16xf32>, vector<8x16xf32> -> vector<8x32xf32>
    %c0_34 = arith.constant 0 : index
    %c0_35 = arith.constant 0 : index
    %c0_36 = arith.constant 0 : index
    %63 = vector.load %arg8[%c0_34, %c0_35, %c0_36] : memref<2x32x32xf32, #tpu.memory_space<vmem>>, vector<1x32x32xf32>
    %64 = vector.shape_cast %63 : vector<1x32x32xf32> to vector<32x32xf32>
    %cst_37 = arith.constant dense<0.000000e+00> : vector<8x32xf32>
    %65 = tpu.matmul %62, %64, %cst_37 {dimension_numbers = #tpu.dot_dimension_numbers<[1], [0], [0], [1], [0, 0, 1, 1], [], []>} : vector<8x32xf32>, vector<32x32xf32>, vector<8x32xf32> -> vector<8x32xf32>
    %c0_38 = arith.constant 0 : index
    %c0_39 = arith.constant 0 : index
    %c0_40 = arith.constant 0 : index
    %66 = vector.load %arg9[%c0_38, %c0_39, %c0_40] : memref<2x1x32xf32, #tpu.memory_space<vmem>>, vector<1x1x32xf32>
    %67 = vector.shape_cast %66 : vector<1x1x32xf32> to vector<1x32xf32>
    %68 = vector.broadcast %67 : vector<1x32xf32> to vector<8x32xf32>
    %69 = arith.addf %65, %68 : vector<8x32xf32>
    %70 = arith.addf %1, %69 : vector<8x32xf32>
    %c0_41 = arith.constant 0 : index
    %c0_42 = arith.constant 0 : index
    %c0_43 = arith.constant 0 : index
    %71 = vector.load %arg10[%c0_41, %c0_42, %c0_43] : memref<2x1x32xf32, #tpu.memory_space<vmem>>, vector<1x1x32xf32>
    %72 = vector.shape_cast %71 : vector<1x1x32xf32> to vector<1x32xf32>
    %c0_44 = arith.constant 0 : index
    %c0_45 = arith.constant 0 : index
    %c0_46 = arith.constant 0 : index
    %73 = vector.load %arg11[%c0_44, %c0_45, %c0_46] : memref<2x1x32xf32, #tpu.memory_space<vmem>>, vector<1x1x32xf32>
    %74 = vector.shape_cast %73 : vector<1x1x32xf32> to vector<1x32xf32>
    %cst_47 = arith.constant dense<0.000000e+00> : vector<8xf32>
    %75 = vector.multi_reduction <add>, %70, %cst_47 [1] : vector<8x32xf32> to vector<8xf32>
    %76 = vector.shape_cast %75 : vector<8xf32> to vector<8x1xf32>
    %cst_48 = arith.constant 3.200000e+01 : f32
    %77 = vector.broadcast %cst_48 : f32 to vector<8x1xf32>
    %78 = arith.divf %76, %77 : vector<8x1xf32>
    %79 = vector.broadcast %78 : vector<8x1xf32> to vector<8x32xf32>
    %80 = arith.subf %70, %79 : vector<8x32xf32>
    %81 = arith.mulf %80, %80 : vector<8x32xf32>
    %cst_49 = arith.constant dense<0.000000e+00> : vector<8xf32>
    %82 = vector.multi_reduction <add>, %81, %cst_49 [1] : vector<8x32xf32> to vector<8xf32>
    %83 = vector.shape_cast %82 : vector<8xf32> to vector<8x1xf32>
    %cst_50 = arith.constant 3.200000e+01 : f32
    %84 = vector.broadcast %cst_50 : f32 to vector<8x1xf32>
    %85 = arith.divf %83, %84 : vector<8x1xf32>
    %cst_51 = arith.constant 9.99999974E-6 : f32
    %86 = vector.broadcast %cst_51 : f32 to vector<8x1xf32>
    %87 = arith.addf %85, %86 : vector<8x1xf32>
    %88 = math.rsqrt %87 : vector<8x1xf32>
    %89 = vector.broadcast %88 : vector<8x1xf32> to vector<8x32xf32>
    %90 = arith.mulf %80, %89 : vector<8x32xf32>
    %91 = vector.broadcast %72 : vector<1x32xf32> to vector<8x32xf32>
    %92 = arith.mulf %90, %91 : vector<8x32xf32>
    %93 = vector.broadcast %74 : vector<1x32xf32> to vector<8x32xf32>
    %94 = arith.addf %92, %93 : vector<8x32xf32>
    %c0_52 = arith.constant 0 : index
    %c0_53 = arith.constant 0 : index
    %c0_54 = arith.constant 0 : index
    %95 = vector.load %arg12[%c0_52, %c0_53, %c0_54] : memref<2x32x64xf32, #tpu.memory_space<vmem>>, vector<1x32x64xf32>
    %96 = vector.shape_cast %95 : vector<1x32x64xf32> to vector<32x64xf32>
    %cst_55 = arith.constant dense<0.000000e+00> : vector<8x64xf32>
    %97 = tpu.matmul %94, %96, %cst_55 {dimension_numbers = #tpu.dot_dimension_numbers<[1], [0], [0], [1], [0, 0, 1, 1], [], []>} : vector<8x32xf32>, vector<32x64xf32>, vector<8x64xf32> -> vector<8x64xf32>
    %c0_56 = arith.constant 0 : index
    %c0_57 = arith.constant 0 : index
    %c0_58 = arith.constant 0 : index
    %98 = vector.load %arg13[%c0_56, %c0_57, %c0_58] : memref<2x1x64xf32, #tpu.memory_space<vmem>>, vector<1x1x64xf32>
    %99 = vector.shape_cast %98 : vector<1x1x64xf32> to vector<1x64xf32>
    %100 = vector.broadcast %99 : vector<1x64xf32> to vector<8x64xf32>
    %101 = arith.addf %97, %100 : vector<8x64xf32>
    %cst_59 = arith.constant 0.000000e+00 : f32
    %102 = vector.broadcast %cst_59 : f32 to vector<8x64xf32>
    %103 = arith.maximumf %101, %102 : vector<8x64xf32>
    %c0_60 = arith.constant 0 : index
    %c0_61 = arith.constant 0 : index
    %c0_62 = arith.constant 0 : index
    %104 = vector.load %arg14[%c0_60, %c0_61, %c0_62] : memref<2x64x32xf32, #tpu.memory_space<vmem>>, vector<1x64x32xf32>
    %105 = vector.shape_cast %104 : vector<1x64x32xf32> to vector<64x32xf32>
    %cst_63 = arith.constant dense<0.000000e+00> : vector<8x32xf32>
    %106 = tpu.matmul %103, %105, %cst_63 {dimension_numbers = #tpu.dot_dimension_numbers<[1], [0], [0], [1], [0, 0, 1, 1], [], []>} : vector<8x64xf32>, vector<64x32xf32>, vector<8x32xf32> -> vector<8x32xf32>
    %c0_64 = arith.constant 0 : index
    %c0_65 = arith.constant 0 : index
    %c0_66 = arith.constant 0 : index
    %107 = vector.load %arg15[%c0_64, %c0_65, %c0_66] : memref<2x1x32xf32, #tpu.memory_space<vmem>>, vector<1x1x32xf32>
    %108 = vector.shape_cast %107 : vector<1x1x32xf32> to vector<1x32xf32>
    %109 = vector.broadcast %108 : vector<1x32xf32> to vector<8x32xf32>
    %110 = arith.addf %106, %109 : vector<8x32xf32>
    %111 = arith.addf %94, %110 : vector<8x32xf32>
    %c0_67 = arith.constant 0 : index
    %c0_68 = arith.constant 0 : index
    %c0_69 = arith.constant 0 : index
    %112 = vector.load %arg16[%c0_67, %c0_68, %c0_69] : memref<2x1x32xf32, #tpu.memory_space<vmem>>, vector<1x1x32xf32>
    %113 = vector.shape_cast %112 : vector<1x1x32xf32> to vector<1x32xf32>
    %c0_70 = arith.constant 0 : index
    %c0_71 = arith.constant 0 : index
    %c0_72 = arith.constant 0 : index
    %114 = vector.load %arg17[%c0_70, %c0_71, %c0_72] : memref<2x1x32xf32, #tpu.memory_space<vmem>>, vector<1x1x32xf32>
    %115 = vector.shape_cast %114 : vector<1x1x32xf32> to vector<1x32xf32>
    %cst_73 = arith.constant dense<0.000000e+00> : vector<8xf32>
    %116 = vector.multi_reduction <add>, %111, %cst_73 [1] : vector<8x32xf32> to vector<8xf32>
    %117 = vector.shape_cast %116 : vector<8xf32> to vector<8x1xf32>
    %cst_74 = arith.constant 3.200000e+01 : f32
    %118 = vector.broadcast %cst_74 : f32 to vector<8x1xf32>
    %119 = arith.divf %117, %118 : vector<8x1xf32>
    %120 = vector.broadcast %119 : vector<8x1xf32> to vector<8x32xf32>
    %121 = arith.subf %111, %120 : vector<8x32xf32>
    %122 = arith.mulf %121, %121 : vector<8x32xf32>
    %cst_75 = arith.constant dense<0.000000e+00> : vector<8xf32>
    %123 = vector.multi_reduction <add>, %122, %cst_75 [1] : vector<8x32xf32> to vector<8xf32>
    %124 = vector.shape_cast %123 : vector<8xf32> to vector<8x1xf32>
    %cst_76 = arith.constant 3.200000e+01 : f32
    %125 = vector.broadcast %cst_76 : f32 to vector<8x1xf32>
    %126 = arith.divf %124, %125 : vector<8x1xf32>
    %cst_77 = arith.constant 9.99999974E-6 : f32
    %127 = vector.broadcast %cst_77 : f32 to vector<8x1xf32>
    %128 = arith.addf %126, %127 : vector<8x1xf32>
    %129 = math.rsqrt %128 : vector<8x1xf32>
    %130 = vector.broadcast %129 : vector<8x1xf32> to vector<8x32xf32>
    %131 = arith.mulf %121, %130 : vector<8x32xf32>
    %132 = vector.broadcast %113 : vector<1x32xf32> to vector<8x32xf32>
    %133 = arith.mulf %131, %132 : vector<8x32xf32>
    %134 = vector.broadcast %115 : vector<1x32xf32> to vector<8x32xf32>
    %135 = arith.addf %133, %134 : vector<8x32xf32>
    %c1 = arith.constant 1 : index
    %c0_78 = arith.constant 0 : index
    %c0_79 = arith.constant 0 : index
    %136 = vector.load %arg2[%c1, %c0_78, %c0_79] : memref<2x32x32xf32, #tpu.memory_space<vmem>>, vector<1x32x32xf32>
    %137 = vector.shape_cast %136 : vector<1x32x32xf32> to vector<32x32xf32>
    %cst_80 = arith.constant dense<0.000000e+00> : vector<8x32xf32>
    %138 = tpu.matmul %135, %137, %cst_80 {dimension_numbers = #tpu.dot_dimension_numbers<[1], [0], [0], [1], [0, 0, 1, 1], [], []>} : vector<8x32xf32>, vector<32x32xf32>, vector<8x32xf32> -> vector<8x32xf32>
    %c1_81 = arith.constant 1 : index
    %c0_82 = arith.constant 0 : index
    %c0_83 = arith.constant 0 : index
    %139 = vector.load %arg3[%c1_81, %c0_82, %c0_83] : memref<2x1x32xf32, #tpu.memory_space<vmem>>, vector<1x1x32xf32>
    %140 = vector.shape_cast %139 : vector<1x1x32xf32> to vector<1x32xf32>
    %141 = vector.broadcast %140 : vector<1x32xf32> to vector<8x32xf32>
    %142 = arith.addf %138, %141 : vector<8x32xf32>
    %c1_84 = arith.constant 1 : index
    %c0_85 = arith.constant 0 : index
    %c0_86 = arith.constant 0 : index
    %143 = vector.load %arg4[%c1_84, %c0_85, %c0_86] : memref<2x32x32xf32, #tpu.memory_space<vmem>>, vector<1x32x32xf32>
    %144 = vector.shape_cast %143 : vector<1x32x32xf32> to vector<32x32xf32>
    %cst_87 = arith.constant dense<0.000000e+00> : vector<8x32xf32>
    %145 = tpu.matmul %135, %144, %cst_87 {dimension_numbers = #tpu.dot_dimension_numbers<[1], [0], [0], [1], [0, 0, 1, 1], [], []>} : vector<8x32xf32>, vector<32x32xf32>, vector<8x32xf32> -> vector<8x32xf32>
    %c1_88 = arith.constant 1 : index
    %c0_89 = arith.constant 0 : index
    %c0_90 = arith.constant 0 : index
    %146 = vector.load %arg5[%c1_88, %c0_89, %c0_90] : memref<2x1x32xf32, #tpu.memory_space<vmem>>, vector<1x1x32xf32>
    %147 = vector.shape_cast %146 : vector<1x1x32xf32> to vector<1x32xf32>
    %148 = vector.broadcast %147 : vector<1x32xf32> to vector<8x32xf32>
    %149 = arith.addf %145, %148 : vector<8x32xf32>
    %c1_91 = arith.constant 1 : index
    %c0_92 = arith.constant 0 : index
    %c0_93 = arith.constant 0 : index
    %150 = vector.load %arg6[%c1_91, %c0_92, %c0_93] : memref<2x32x32xf32, #tpu.memory_space<vmem>>, vector<1x32x32xf32>
    %151 = vector.shape_cast %150 : vector<1x32x32xf32> to vector<32x32xf32>
    %cst_94 = arith.constant dense<0.000000e+00> : vector<8x32xf32>
    %152 = tpu.matmul %135, %151, %cst_94 {dimension_numbers = #tpu.dot_dimension_numbers<[1], [0], [0], [1], [0, 0, 1, 1], [], []>} : vector<8x32xf32>, vector<32x32xf32>, vector<8x32xf32> -> vector<8x32xf32>
    %c1_95 = arith.constant 1 : index
    %c0_96 = arith.constant 0 : index
    %c0_97 = arith.constant 0 : index
    %153 = vector.load %arg7[%c1_95, %c0_96, %c0_97] : memref<2x1x32xf32, #tpu.memory_space<vmem>>, vector<1x1x32xf32>
    %154 = vector.shape_cast %153 : vector<1x1x32xf32> to vector<1x32xf32>
    %155 = vector.broadcast %154 : vector<1x32xf32> to vector<8x32xf32>
    %156 = arith.addf %152, %155 : vector<8x32xf32>
    %157 = vector.extract_strided_slice %142 {offsets = [0, 0], sizes = [8, 16], strides = [1, 1]} : vector<8x32xf32> to vector<8x16xf32>
    %158 = vector.extract_strided_slice %149 {offsets = [0, 0], sizes = [8, 16], strides = [1, 1]} : vector<8x32xf32> to vector<8x16xf32>
    %159 = vector.extract_strided_slice %156 {offsets = [0, 0], sizes = [8, 16], strides = [1, 1]} : vector<8x32xf32> to vector<8x16xf32>
    %cst_98 = arith.constant dense<0.000000e+00> : vector<8x8xf32>
    %160 = tpu.matmul %157, %158, %cst_98 {dimension_numbers = #tpu.dot_dimension_numbers<[1], [1], [0], [0], [0, 0, 1, 0], [], []>} : vector<8x16xf32>, vector<8x16xf32>, vector<8x8xf32> -> vector<8x8xf32>
    %cst_99 = arith.constant 2.500000e-01 : f32
    %161 = vector.broadcast %cst_99 : f32 to vector<8x8xf32>
    %162 = arith.mulf %160, %161 : vector<8x8xf32>
    %cst_100 = arith.constant -1.000000e+30 : f32
    %163 = vector.broadcast %cst_100 : f32 to vector<8x8xf32>
    %164 = arith.select %4, %162, %163 : vector<8x8xi1>, vector<8x8xf32>
    %cst_101 = arith.constant dense<0xFF800000> : vector<8xf32>
    %165 = vector.multi_reduction <maximumf>, %164, %cst_101 [1] : vector<8x8xf32> to vector<8xf32>
    %166 = vector.shape_cast %165 : vector<8xf32> to vector<8x1xf32>
    %167 = vector.broadcast %166 : vector<8x1xf32> to vector<8x8xf32>
    %168 = arith.subf %164, %167 : vector<8x8xf32>
    %169 = math.exp %168 : vector<8x8xf32>
    %cst_102 = arith.constant dense<0.000000e+00> : vector<8xf32>
    %170 = vector.multi_reduction <add>, %169, %cst_102 [1] : vector<8x8xf32> to vector<8xf32>
    %171 = vector.shape_cast %170 : vector<8xf32> to vector<8x1xf32>
    %172 = vector.broadcast %171 : vector<8x1xf32> to vector<8x8xf32>
    %173 = arith.divf %169, %172 : vector<8x8xf32>
    %cst_103 = arith.constant dense<0.000000e+00> : vector<8x16xf32>
    %174 = tpu.matmul %173, %159, %cst_103 {dimension_numbers = #tpu.dot_dimension_numbers<[1], [0], [0], [1], [0, 0, 1, 1], [], []>} : vector<8x8xf32>, vector<8x16xf32>, vector<8x16xf32> -> vector<8x16xf32>
    %175 = vector.extract_strided_slice %142 {offsets = [0, 16], sizes = [8, 16], strides = [1, 1]} : vector<8x32xf32> to vector<8x16xf32>
    %176 = vector.extract_strided_slice %149 {offsets = [0, 16], sizes = [8, 16], strides = [1, 1]} : vector<8x32xf32> to vector<8x16xf32>
    %177 = vector.extract_strided_slice %156 {offsets = [0, 16], sizes = [8, 16], strides = [1, 1]} : vector<8x32xf32> to vector<8x16xf32>
    %cst_104 = arith.constant dense<0.000000e+00> : vector<8x8xf32>
    %178 = tpu.matmul %175, %176, %cst_104 {dimension_numbers = #tpu.dot_dimension_numbers<[1], [1], [0], [0], [0, 0, 1, 0], [], []>} : vector<8x16xf32>, vector<8x16xf32>, vector<8x8xf32> -> vector<8x8xf32>
    %cst_105 = arith.constant 2.500000e-01 : f32
    %179 = vector.broadcast %cst_105 : f32 to vector<8x8xf32>
    %180 = arith.mulf %178, %179 : vector<8x8xf32>
    %cst_106 = arith.constant -1.000000e+30 : f32
    %181 = vector.broadcast %cst_106 : f32 to vector<8x8xf32>
    %182 = arith.select %4, %180, %181 : vector<8x8xi1>, vector<8x8xf32>
    %cst_107 = arith.constant dense<0xFF800000> : vector<8xf32>
    %183 = vector.multi_reduction <maximumf>, %182, %cst_107 [1] : vector<8x8xf32> to vector<8xf32>
    %184 = vector.shape_cast %183 : vector<8xf32> to vector<8x1xf32>
    %185 = vector.broadcast %184 : vector<8x1xf32> to vector<8x8xf32>
    %186 = arith.subf %182, %185 : vector<8x8xf32>
    %187 = math.exp %186 : vector<8x8xf32>
    %cst_108 = arith.constant dense<0.000000e+00> : vector<8xf32>
    %188 = vector.multi_reduction <add>, %187, %cst_108 [1] : vector<8x8xf32> to vector<8xf32>
    %189 = vector.shape_cast %188 : vector<8xf32> to vector<8x1xf32>
    %190 = vector.broadcast %189 : vector<8x1xf32> to vector<8x8xf32>
    %191 = arith.divf %187, %190 : vector<8x8xf32>
    %cst_109 = arith.constant dense<0.000000e+00> : vector<8x16xf32>
    %192 = tpu.matmul %191, %177, %cst_109 {dimension_numbers = #tpu.dot_dimension_numbers<[1], [0], [0], [1], [0, 0, 1, 1], [], []>} : vector<8x8xf32>, vector<8x16xf32>, vector<8x16xf32> -> vector<8x16xf32>
    %193 = tpu.concatenate %174, %192 in 1 : vector<8x16xf32>, vector<8x16xf32> -> vector<8x32xf32>
    %c1_110 = arith.constant 1 : index
    %c0_111 = arith.constant 0 : index
    %c0_112 = arith.constant 0 : index
    %194 = vector.load %arg8[%c1_110, %c0_111, %c0_112] : memref<2x32x32xf32, #tpu.memory_space<vmem>>, vector<1x32x32xf32>
    %195 = vector.shape_cast %194 : vector<1x32x32xf32> to vector<32x32xf32>
    %cst_113 = arith.constant dense<0.000000e+00> : vector<8x32xf32>
    %196 = tpu.matmul %193, %195, %cst_113 {dimension_numbers = #tpu.dot_dimension_numbers<[1], [0], [0], [1], [0, 0, 1, 1], [], []>} : vector<8x32xf32>, vector<32x32xf32>, vector<8x32xf32> -> vector<8x32xf32>
    %c1_114 = arith.constant 1 : index
    %c0_115 = arith.constant 0 : index
    %c0_116 = arith.constant 0 : index
    %197 = vector.load %arg9[%c1_114, %c0_115, %c0_116] : memref<2x1x32xf32, #tpu.memory_space<vmem>>, vector<1x1x32xf32>
    %198 = vector.shape_cast %197 : vector<1x1x32xf32> to vector<1x32xf32>
    %199 = vector.broadcast %198 : vector<1x32xf32> to vector<8x32xf32>
    %200 = arith.addf %196, %199 : vector<8x32xf32>
    %201 = arith.addf %135, %200 : vector<8x32xf32>
    %c1_117 = arith.constant 1 : index
    %c0_118 = arith.constant 0 : index
    %c0_119 = arith.constant 0 : index
    %202 = vector.load %arg10[%c1_117, %c0_118, %c0_119] : memref<2x1x32xf32, #tpu.memory_space<vmem>>, vector<1x1x32xf32>
    %203 = vector.shape_cast %202 : vector<1x1x32xf32> to vector<1x32xf32>
    %c1_120 = arith.constant 1 : index
    %c0_121 = arith.constant 0 : index
    %c0_122 = arith.constant 0 : index
    %204 = vector.load %arg11[%c1_120, %c0_121, %c0_122] : memref<2x1x32xf32, #tpu.memory_space<vmem>>, vector<1x1x32xf32>
    %205 = vector.shape_cast %204 : vector<1x1x32xf32> to vector<1x32xf32>
    %cst_123 = arith.constant dense<0.000000e+00> : vector<8xf32>
    %206 = vector.multi_reduction <add>, %201, %cst_123 [1] : vector<8x32xf32> to vector<8xf32>
    %207 = vector.shape_cast %206 : vector<8xf32> to vector<8x1xf32>
    %cst_124 = arith.constant 3.200000e+01 : f32
    %208 = vector.broadcast %cst_124 : f32 to vector<8x1xf32>
    %209 = arith.divf %207, %208 : vector<8x1xf32>
    %210 = vector.broadcast %209 : vector<8x1xf32> to vector<8x32xf32>
    %211 = arith.subf %201, %210 : vector<8x32xf32>
    %212 = arith.mulf %211, %211 : vector<8x32xf32>
    %cst_125 = arith.constant dense<0.000000e+00> : vector<8xf32>
    %213 = vector.multi_reduction <add>, %212, %cst_125 [1] : vector<8x32xf32> to vector<8xf32>
    %214 = vector.shape_cast %213 : vector<8xf32> to vector<8x1xf32>
    %cst_126 = arith.constant 3.200000e+01 : f32
    %215 = vector.broadcast %cst_126 : f32 to vector<8x1xf32>
    %216 = arith.divf %214, %215 : vector<8x1xf32>
    %cst_127 = arith.constant 9.99999974E-6 : f32
    %217 = vector.broadcast %cst_127 : f32 to vector<8x1xf32>
    %218 = arith.addf %216, %217 : vector<8x1xf32>
    %219 = math.rsqrt %218 : vector<8x1xf32>
    %220 = vector.broadcast %219 : vector<8x1xf32> to vector<8x32xf32>
    %221 = arith.mulf %211, %220 : vector<8x32xf32>
    %222 = vector.broadcast %203 : vector<1x32xf32> to vector<8x32xf32>
    %223 = arith.mulf %221, %222 : vector<8x32xf32>
    %224 = vector.broadcast %205 : vector<1x32xf32> to vector<8x32xf32>
    %225 = arith.addf %223, %224 : vector<8x32xf32>
    %c1_128 = arith.constant 1 : index
    %c0_129 = arith.constant 0 : index
    %c0_130 = arith.constant 0 : index
    %226 = vector.load %arg12[%c1_128, %c0_129, %c0_130] : memref<2x32x64xf32, #tpu.memory_space<vmem>>, vector<1x32x64xf32>
    %227 = vector.shape_cast %226 : vector<1x32x64xf32> to vector<32x64xf32>
    %cst_131 = arith.constant dense<0.000000e+00> : vector<8x64xf32>
    %228 = tpu.matmul %225, %227, %cst_131 {dimension_numbers = #tpu.dot_dimension_numbers<[1], [0], [0], [1], [0, 0, 1, 1], [], []>} : vector<8x32xf32>, vector<32x64xf32>, vector<8x64xf32> -> vector<8x64xf32>
    %c1_132 = arith.constant 1 : index
    %c0_133 = arith.constant 0 : index
    %c0_134 = arith.constant 0 : index
    %229 = vector.load %arg13[%c1_132, %c0_133, %c0_134] : memref<2x1x64xf32, #tpu.memory_space<vmem>>, vector<1x1x64xf32>
    %230 = vector.shape_cast %229 : vector<1x1x64xf32> to vector<1x64xf32>
    %231 = vector.broadcast %230 : vector<1x64xf32> to vector<8x64xf32>
    %232 = arith.addf %228, %231 : vector<8x64xf32>
    %cst_135 = arith.constant 0.000000e+00 : f32
    %233 = vector.broadcast %cst_135 : f32 to vector<8x64xf32>
    %234 = arith.maximumf %232, %233 : vector<8x64xf32>
    %c1_136 = arith.constant 1 : index
    %c0_137 = arith.constant 0 : index
    %c0_138 = arith.constant 0 : index
    %235 = vector.load %arg14[%c1_136, %c0_137, %c0_138] : memref<2x64x32xf32, #tpu.memory_space<vmem>>, vector<1x64x32xf32>
    %236 = vector.shape_cast %235 : vector<1x64x32xf32> to vector<64x32xf32>
    %cst_139 = arith.constant dense<0.000000e+00> : vector<8x32xf32>
    %237 = tpu.matmul %234, %236, %cst_139 {dimension_numbers = #tpu.dot_dimension_numbers<[1], [0], [0], [1], [0, 0, 1, 1], [], []>} : vector<8x64xf32>, vector<64x32xf32>, vector<8x32xf32> -> vector<8x32xf32>
    %c1_140 = arith.constant 1 : index
    %c0_141 = arith.constant 0 : index
    %c0_142 = arith.constant 0 : index
    %238 = vector.load %arg15[%c1_140, %c0_141, %c0_142] : memref<2x1x32xf32, #tpu.memory_space<vmem>>, vector<1x1x32xf32>
    %239 = vector.shape_cast %238 : vector<1x1x32xf32> to vector<1x32xf32>
    %240 = vector.broadcast %239 : vector<1x32xf32> to vector<8x32xf32>
    %241 = arith.addf %237, %240 : vector<8x32xf32>
    %242 = arith.addf %225, %241 : vector<8x32xf32>
    %c1_143 = arith.constant 1 : index
    %c0_144 = arith.constant 0 : index
    %c0_145 = arith.constant 0 : index
    %243 = vector.load %arg16[%c1_143, %c0_144, %c0_145] : memref<2x1x32xf32, #tpu.memory_space<vmem>>, vector<1x1x32xf32>
    %244 = vector.shape_cast %243 : vector<1x1x32xf32> to vector<1x32xf32>
    %c1_146 = arith.constant 1 : index
    %c0_147 = arith.constant 0 : index
    %c0_148 = arith.constant 0 : index
    %245 = vector.load %arg17[%c1_146, %c0_147, %c0_148] : memref<2x1x32xf32, #tpu.memory_space<vmem>>, vector<1x1x32xf32>
    %246 = vector.shape_cast %245 : vector<1x1x32xf32> to vector<1x32xf32>
    %cst_149 = arith.constant dense<0.000000e+00> : vector<8xf32>
    %247 = vector.multi_reduction <add>, %242, %cst_149 [1] : vector<8x32xf32> to vector<8xf32>
    %248 = vector.shape_cast %247 : vector<8xf32> to vector<8x1xf32>
    %cst_150 = arith.constant 3.200000e+01 : f32
    %249 = vector.broadcast %cst_150 : f32 to vector<8x1xf32>
    %250 = arith.divf %248, %249 : vector<8x1xf32>
    %251 = vector.broadcast %250 : vector<8x1xf32> to vector<8x32xf32>
    %252 = arith.subf %242, %251 : vector<8x32xf32>
    %253 = arith.mulf %252, %252 : vector<8x32xf32>
    %cst_151 = arith.constant dense<0.000000e+00> : vector<8xf32>
    %254 = vector.multi_reduction <add>, %253, %cst_151 [1] : vector<8x32xf32> to vector<8xf32>
    %255 = vector.shape_cast %254 : vector<8xf32> to vector<8x1xf32>
    %cst_152 = arith.constant 3.200000e+01 : f32
    %256 = vector.broadcast %cst_152 : f32 to vector<8x1xf32>
    %257 = arith.divf %255, %256 : vector<8x1xf32>
    %cst_153 = arith.constant 9.99999974E-6 : f32
    %258 = vector.broadcast %cst_153 : f32 to vector<8x1xf32>
    %259 = arith.addf %257, %258 : vector<8x1xf32>
    %260 = math.rsqrt %259 : vector<8x1xf32>
    %261 = vector.broadcast %260 : vector<8x1xf32> to vector<8x32xf32>
    %262 = arith.mulf %252, %261 : vector<8x32xf32>
    %263 = vector.broadcast %244 : vector<1x32xf32> to vector<8x32xf32>
    %264 = arith.mulf %262, %263 : vector<8x32xf32>
    %265 = vector.broadcast %246 : vector<1x32xf32> to vector<8x32xf32>
    %266 = arith.addf %264, %265 : vector<8x32xf32>
    %c0_154 = arith.constant 0 : index
    %c0_155 = arith.constant 0 : index
    %267 = vector.load %arg18[%c0_154, %c0_155] : memref<1x32xf32, #tpu.memory_space<vmem>>, vector<1x32xf32>
    %c0_156 = arith.constant 0 : index
    %c0_157 = arith.constant 0 : index
    %268 = vector.load %arg19[%c0_156, %c0_157] : memref<1x32xf32, #tpu.memory_space<vmem>>, vector<1x32xf32>
    %cst_158 = arith.constant dense<0.000000e+00> : vector<8xf32>
    %269 = vector.multi_reduction <add>, %266, %cst_158 [1] : vector<8x32xf32> to vector<8xf32>
    %270 = vector.shape_cast %269 : vector<8xf32> to vector<8x1xf32>
    %cst_159 = arith.constant 3.200000e+01 : f32
    %271 = vector.broadcast %cst_159 : f32 to vector<8x1xf32>
    %272 = arith.divf %270, %271 : vector<8x1xf32>
    %273 = vector.broadcast %272 : vector<8x1xf32> to vector<8x32xf32>
    %274 = arith.subf %266, %273 : vector<8x32xf32>
    %275 = arith.mulf %274, %274 : vector<8x32xf32>
    %cst_160 = arith.constant dense<0.000000e+00> : vector<8xf32>
    %276 = vector.multi_reduction <add>, %275, %cst_160 [1] : vector<8x32xf32> to vector<8xf32>
    %277 = vector.shape_cast %276 : vector<8xf32> to vector<8x1xf32>
    %cst_161 = arith.constant 3.200000e+01 : f32
    %278 = vector.broadcast %cst_161 : f32 to vector<8x1xf32>
    %279 = arith.divf %277, %278 : vector<8x1xf32>
    %cst_162 = arith.constant 9.99999974E-6 : f32
    %280 = vector.broadcast %cst_162 : f32 to vector<8x1xf32>
    %281 = arith.addf %279, %280 : vector<8x1xf32>
    %282 = math.rsqrt %281 : vector<8x1xf32>
    %283 = vector.broadcast %282 : vector<8x1xf32> to vector<8x32xf32>
    %284 = arith.mulf %274, %283 : vector<8x32xf32>
    %285 = vector.broadcast %267 : vector<1x32xf32> to vector<8x32xf32>
    %286 = arith.mulf %284, %285 : vector<8x32xf32>
    %287 = vector.broadcast %268 : vector<1x32xf32> to vector<8x32xf32>
    %288 = arith.addf %286, %287 : vector<8x32xf32>
    %c0_163 = arith.constant 0 : index
    %c0_164 = arith.constant 0 : index
    %c0_165 = arith.constant 0 : index
    %289 = vector.load %arg20[%c0_163, %c0_164, %c0_165] : memref<1x8x32xf32, #tpu.memory_space<vmem>>, vector<1x8x32xf32>
    %290 = vector.shape_cast %289 : vector<1x8x32xf32> to vector<8x32xf32>
    %291 = vector.shape_cast %288 : vector<8x32xf32> to vector<1x8x32xf32>
    tpu.vector_store %arg20[%c0_163, %c0_164, %c0_165], %291 {strides = array<i32>} : memref<1x8x32xf32, #tpu.memory_space<vmem>>, vector<1x8x32xf32>,
    return
  }
  func.func @transform_0(%arg0: i32) -> (i32, i32, i32) {
    %c0_i32 = arith.constant 0 : i32
    %c0_i32_0 = arith.constant 0 : i32
    %c0_i32_1 = arith.constant 0 : i32
    return %arg0, %c0_i32, %c0_i32_0 : i32, i32, i32
  }
  func.func @transform_1(%arg0: i32) -> (i32, i32, i32) {
    %c0_i32 = arith.constant 0 : i32
    %c0_i32_0 = arith.constant 0 : i32
    %c0_i32_1 = arith.constant 0 : i32
    %c0_i32_2 = arith.constant 0 : i32
    return %c0_i32, %c0_i32_0, %c0_i32_1 : i32, i32, i32
  }
  func.func @transform_2(%arg0: i32) -> (i32, i32, i32) {
    %c0_i32 = arith.constant 0 : i32
    %c0_i32_0 = arith.constant 0 : i32
    %c0_i32_1 = arith.constant 0 : i32
    %c0_i32_2 = arith.constant 0 : i32
    return %c0_i32, %c0_i32_0, %c0_i32_1 : i32, i32, i32
  }
  func.func @transform_3(%arg0: i32) -> (i32, i32, i32) {
    %c0_i32 = arith.constant 0 : i32
    %c0_i32_0 = arith.constant 0 : i32
    %c0_i32_1 = arith.constant 0 : i32
    %c0_i32_2 = arith.constant 0 : i32
    return %c0_i32, %c0_i32_0, %c0_i32_1 : i32, i32, i32
  }
  func.func @transform_4(%arg0: i32) -> (i32, i32, i32) {
    %c0_i32 = arith.constant 0 : i32
    %c0_i32_0 = arith.constant 0 : i32
    %c0_i32_1 = arith.constant 0 : i32
    %c0_i32_2 = arith.constant 0 : i32
    return %c0_i32, %c0_i32_0, %c0_i32_1 : i32, i32, i32
  }
  func.func @transform_5(%arg0: i32) -> (i32, i32, i32) {
    %c0_i32 = arith.constant 0 : i32
    %c0_i32_0 = arith.constant 0 : i32
    %c0_i32_1 = arith.constant 0 : i32
    %c0_i32_2 = arith.constant 0 : i32
    return %c0_i32, %c0_i32_0, %c0_i32_1 : i32, i32, i32
  }
  func.func @transform_6(%arg0: i32) -> (i32, i32, i32) {
    %c0_i32 = arith.constant 0 : i32
    %c0_i32_0 = arith.constant 0 : i32
    %c0_i32_1 = arith.constant 0 : i32
    %c0_i32_2 = arith.constant 0 : i32
    return %c0_i32, %c0_i32_0, %c0_i32_1 : i32, i32, i32
  }
  func.func @transform_7(%arg0: i32) -> (i32, i32, i32) {
    %c0_i32 = arith.constant 0 : i32
    %c0_i32_0 = arith.constant 0 : i32
    %c0_i32_1 = arith.constant 0 : i32
    %c0_i32_2 = arith.constant 0 : i32
    return %c0_i32, %c0_i32_0, %c0_i32_1 : i32, i32, i32
  }
  func.func @transform_8(%arg0: i32) -> (i32, i32, i32) {
    %c0_i32 = arith.constant 0 : i32
    %c0_i32_0 = arith.constant 0 : i32
    %c0_i32_1 = arith.constant 0 : i32
    %c0_i32_2 = arith.constant 0 : i32
    return %c0_i32, %c0_i32_0, %c0_i32_1 : i32, i32, i32
  }
  func.func @transform_9(%arg0: i32) -> (i32, i32, i32) {
    %c0_i32 = arith.constant 0 : i32
    %c0_i32_0 = arith.constant 0 : i32
    %c0_i32_1 = arith.constant 0 : i32
    %c0_i32_2 = arith.constant 0 : i32
    return %c0_i32, %c0_i32_0, %c0_i32_1 : i32, i32, i32
  }
  func.func @transform_10(%arg0: i32) -> (i32, i32, i32) {
    %c0_i32 = arith.constant 0 : i32
    %c0_i32_0 = arith.constant 0 : i32
    %c0_i32_1 = arith.constant 0 : i32
    %c0_i32_2 = arith.constant 0 : i32
    return %c0_i32, %c0_i32_0, %c0_i32_1 : i32, i32, i32
  }
  func.func @transform_11(%arg0: i32) -> (i32, i32, i32) {
    %c0_i32 = arith.constant 0 : i32
    %c0_i32_0 = arith.constant 0 : i32
    %c0_i32_1 = arith.constant 0 : i32
    %c0_i32_2 = arith.constant 0 : i32
    return %c0_i32, %c0_i32_0, %c0_i32_1 : i32, i32, i32
  }
  func.func @transform_12(%arg0: i32) -> (i32, i32, i32) {
    %c0_i32 = arith.constant 0 : i32
    %c0_i32_0 = arith.constant 0 : i32
    %c0_i32_1 = arith.constant 0 : i32
    %c0_i32_2 = arith.constant 0 : i32
    return %c0_i32, %c0_i32_0, %c0_i32_1 : i32, i32, i32
  }
  func.func @transform_13(%arg0: i32) -> (i32, i32, i32) {
    %c0_i32 = arith.constant 0 : i32
    %c0_i32_0 = arith.constant 0 : i32
    %c0_i32_1 = arith.constant 0 : i32
    %c0_i32_2 = arith.constant 0 : i32
    return %c0_i32, %c0_i32_0, %c0_i32_1 : i32, i32, i32
  }
  func.func @transform_14(%arg0: i32) -> (i32, i32, i32) {
    %c0_i32 = arith.constant 0 : i32
    %c0_i32_0 = arith.constant 0 : i32
    %c0_i32_1 = arith.constant 0 : i32
    %c0_i32_2 = arith.constant 0 : i32
    return %c0_i32, %c0_i32_0, %c0_i32_1 : i32, i32, i32
  }
  func.func @transform_15(%arg0: i32) -> (i32, i32, i32) {
    %c0_i32 = arith.constant 0 : i32
    %c0_i32_0 = arith.constant 0 : i32
    %c0_i32_1 = arith.constant 0 : i32
    %c0_i32_2 = arith.constant 0 : i32
    return %c0_i32, %c0_i32_0, %c0_i32_1 : i32, i32, i32
  }
  func.func @transform_16(%arg0: i32) -> (i32, i32, i32) {
    %c0_i32 = arith.constant 0 : i32
    %c0_i32_0 = arith.constant 0 : i32
    %c0_i32_1 = arith.constant 0 : i32
    %c0_i32_2 = arith.constant 0 : i32
    return %c0_i32, %c0_i32_0, %c0_i32_1 : i32, i32, i32
  }
  func.func @transform_17(%arg0: i32) -> (i32, i32) {
    %c0_i32 = arith.constant 0 : i32
    %c0_i32_0 = arith.constant 0 : i32
    %c0_i32_1 = arith.constant 0 : i32
    return %c0_i32, %c0_i32_0 : i32, i32
  }
  func.func @transform_18(%arg0: i32) -> (i32, i32) {
    %c0_i32 = arith.constant 0 : i32
    %c0_i32_0 = arith.constant 0 : i32
    %c0_i32_1 = arith.constant 0 : i32
    return %c0_i32, %c0_i32_0 : i32, i32
  }
  func.func @transform_19(%arg0: i32) -> (i32, i32, i32) {
    %c0_i32 = arith.constant 0 : i32
    %c0_i32_0 = arith.constant 0 : i32
    %c0_i32_1 = arith.constant 0 : i32
    return %arg0, %c0_i32, %c0_i32_0 : i32, i32, i32
  }
}

</mosaic_0001>

<bundles_post_ra>
// kernel: tpu_custom_call.1
= control target key start
LH: loop header
LB: loop body
LE: loop exit
PB: predicated region body
PF: predicated region fallthrough
CT: control target
= control target key end

     0   :  { %s3998_s0 = inlined_call_operand.hbm [shape: f32[2,8,32], index: 0, kind: input, shape index: {}]   ;;  %s3999_s1 = inlined_call_operand.vmem [shape: f32[2,32,32], index: 1, kind: input, shape index: {}]   ;;  %s4000_s2 = inlined_call_operand.vmem [shape: f32[2,1,32], index: 2, kind: input, shape index: {}]   ;;  %s4001_s3 = inlined_call_operand.vmem [shape: f32[2,32,32], index: 3, kind: input, shape index: {}]   ;;  %s4002_s4 = inlined_call_operand.vmem [shape: f32[2,1,32], index: 4, kind: input, shape index: {}]   ;;  %s4003_s5 = inlined_call_operand.vmem [shape: f32[2,32,32], index: 5, kind: input, shape index: {}]   ;;  %s4004_s6 = inlined_call_operand.vmem [shape: f32[2,1,32], index: 6, kind: input, shape index: {}]   ;;  %s4005_s7 = inlined_call_operand.hbm [shape: f32[2,32,32], index: 7, kind: input, shape index: {}]   ;;  %s4006_s8 = inlined_call_operand.vmem [shape: f32[2,1,32], index: 8, kind: input, shape index: {}]   ;;  %s4007_s9 = inlined_call_operand.vmem [shape: f32[2,1,32], index: 9, kind: input, shape index: {}]   ;;  %s4008_s10 = inlined_call_operand.vmem [shape: f32[2,1,32], index: 10, kind: input, shape index: {}]   ;;  %s4009_s11 = inlined_call_operand.hbm [shape: f32[2,32,64], index: 11, kind: input, shape index: {}]   ;;  %s4010_s12 = inlined_call_operand.vmem [shape: f32[2,1,64], index: 12, kind: input, shape index: {}]   ;;  %s4011_s13 = inlined_call_operand.vmem [shape: f32[2,64,32], index: 13, kind: input, shape index: {}]   ;;  %s4012_s14 = inlined_call_operand.vmem [shape: f32[2,1,32], index: 14, kind: input, shape index: {}]   ;;  %s4013_s15 = inlined_call_operand.vmem [shape: f32[2,1,32], index: 15, kind: input, shape index: {}]   ;;  %s4014_s16 = inlined_call_operand.vmem [shape: f32[2,1,32], index: 16, kind: input, shape index: {}]   ;;  %s4015_s17 = inlined_call_operand.vmem [shape: f32[1,32], index: 17, kind: input, shape index: {}]   ;;  %s4016_s18 = inlined_call_operand.vmem [shape: f32[1,32], index: 18, kind: input, shape index: {}]   ;;  %s4017_s19 = inlined_call_operand.hbm [shape: f32[2,8,32], index: 19, kind: output, shape index: {}]  }
   0x1   :  { %4036 = sst [smem:[#allocation14_spill]] %s3998_s0 }
   0x2   :  { %4037 = sst [smem:[#allocation15_spill]] %s3999_s1 }
   0x3   :  { %4038 = sst [smem:[#allocation16_spill]] %s4000_s2 }
   0x4   :  { %4039 = sst [smem:[#allocation17_spill]] %s4001_s3 }
   0x5   :  { %4040 = sst [smem:[#allocation18_spill]] %s4002_s4 }
   0x6   :  { %4041 = sst [smem:[#allocation19_spill]] %s4003_s5 }
   0x7   :  { %4042 = sst [smem:[#allocation20_spill]] %s4004_s6 }
   0x8   :  { %4043 = sst [smem:[#allocation21_spill]] %s4005_s7 }
   0x9   :  { %4044 = sst [smem:[#allocation22_spill]] %s4006_s8 }
   0xa   :  { %4045 = sst [smem:[#allocation23_spill]] %s4009_s11 }
   0xb   :  { %4046 = sst [smem:[#allocation24_spill]] %s4013_s15 }
   0xc   :  { %4047 = sst [smem:[#allocation25_spill]] %s4014_s16 }
   0xd   :  { %4048 = sst [smem:[#allocation26_spill]] %s4015_s17 }
   0xe   :  { %4049 = sst [smem:[#allocation27_spill]] %s4016_s18 }
   0xf   :  { %4050 = sst [smem:[#allocation28_spill]] %s4017_s19 }
  0x10   :  { %24 = vsyncpa [#allocation3], 0 }
  0x11   :  { %26 = vsyncpa [#allocation3 + $0x1], 0 }
  0x12   :  { %27 = vsyncpa [#allocation6], 0 }
  0x13   :  { %28 = vsyncpa [#allocation4], 0 }
  0x14   :  { %30 = vsyncpa [#allocation4 + $0x1], 0  ;;  %s3420_s0 = smov 0   ;;  %s3422_s30 = smov 0  }
  0x15   :  { %s3424_s20 = smov 0   ;;  %s3426_s21 = smov 0  }
  0x16 LB: > { %4051 = sst [smem:[#allocation12_spill]] %s3295_s0  ;;  %s3441_s1 = sadd.s32 4294967295, %s3307_s21   ;;  %s3307_s21 = sphi %s3426_s21, %s4089_s21   ;;  %s3303_s20 = sphi %s3424_s20, %s4088_s20   ;;  %s3299_s30 = sphi %s3422_s30, %s4087_s30   ;;  %s3295_s0 = sphi %s3420_s0, %s4086_s0  }
  0x17   : > { %s2603_s22 = sadd.s32 4294967294, %s3307_s21   ;;  %p56_p0 = scmp.ne.s32.totalorder %s3299_s30, %s3295_s0 }
  0x18   : > { %p4025_p1 = scmp.eq.s32.totalorder %s3441_s1, 0  ;;  %p464_p3 = scmp.eq.s32.totalorder %s2603_s22, 1 }
  0x19   : > { %p2604_p5 = scmp.ge.s32.totalorder %s3307_s21, 1  ;;  %p471_p7 = scmp.lt.s32.totalorder %s3307_s21, 3 }
  0x1a   : > { %p3450_p4 = por %p4025_p1, %p56_p0  ;;  %p3455_p6 = por %p464_p3, %p56_p0 }
  0x1b   : > { %p3460_p8 = pnand %p2604_p5, %p471_p7  ;;  %s3309_s25 = smov [#allocation5]  }
  0x1c   : > { %s4052_s2 = scalar_select %p3450_p4, 1, 0 }
  0x1d   : > { %s4053_s23 = scalar_select %p3455_p6, 1, 0 }
  0x1e   : > { %s501_s3 = sshll.u32 %s3309_s25, 4  ;;  %p3063_p9 = pneg %p3460_p8  ;;  %s3464_s3 = int_to_ptr.vmem [resolvable:$true] %s501_s3 }
  0x1f   : > { %4054 = sst [smem:[#allocation13_spill]] %s4053_s23  ;;  %s3310_s27 = smov [#allocation7]  }
  0x20   : > { %p3471_p11 = pnand %p3063_p9, %p4025_p1  ;;  %s523_s28 = sshll.u32 %s3310_s27, 4  ;;  %s3475_s28 = int_to_ptr.vmem [resolvable:$true] %s523_s28 }
  0x21   : > { %s4057_s7 = sld [smem:[#allocation21_spill]] }
  0x22   : > { %p3153_p13 = pneg %p3471_p11 }
  0x27   : > { %s3151_s25 = scalar_lea.hbm %s4057_s7, 1024 }
  0x28   : > { %p3152_p12 = scmp.ne.s32.totalorder %s4057_s7, %s3151_s25  ;;  %p3158_p5 = scmp.lt.u32.totalorder %s3151_s25, %s4057_s7 }
  0x2a   : > { %p3154_p0 = pnand %p3153_p13, %p3152_p12 }
  0x2c   : > { %p3155_p3 = pneg %p3154_p0 }
  0x2e   : > { %p3160_p7 = pnand %p3158_p5, %p3155_p3 }
  0x30   : > { %3163 = shalt.err (!%p3160_p7)
}
  0x31   : > { %s3164_s27 = scalar_lea.vmem %s3464_s3, 1024  ;;  %p3172_p2 = scmp.lt.s32.totalorder %s3464_s3, %s3464_s3 }
  0x32   : > { %p3165_p9 = scmp.ne.s32.totalorder %s3464_s3, %s3164_s27  ;;  %p3173_p12 = scmp.lt.s32.totalorder %s3164_s27, %s3164_s27 }
  0x34   : > { %p3167_p10 = pnand %p3165_p9, %p3153_p13  ;;  %p3174_p0 = por %p3173_p12, %p3172_p2 }
  0x36   : > { %p3168_p1 = pneg %p3167_p10 }
  0x38   : > { %p3175_p6 = pnand %p3174_p0, %p3168_p1 }
  0x3a   : > { %3178 = shalt.err (!%p3175_p6)
}
  0x3b   : > { %s3311_s18 = smov 128   ;;  %s3312_s19 = smov 8  }
  0x3c   : > { %3066 = dma.hbm_to_vmem [thread:$0]  (!%p3471_p11), %s4057_s7, 1024, %s3464_s3, [#allocation6], %s3311_s18, %s3311_s18, %s3312_s19  }
  0x3d   : > { %s4058_s11 = sld [smem:[#allocation23_spill]] }
  0x43   : > { %s3179_s25 = scalar_lea.hbm %s4058_s11, 1024 }
  0x44   : > { %p3180_p2 = scmp.ne.s32.totalorder %s4058_s11, %s3179_s25  ;;  %p3186_p10 = scmp.lt.u32.totalorder %s3179_s25, %s4058_s11 }
  0x46   : > { %p3182_p1 = pnand %p3180_p2, %p3153_p13 }
  0x48   : > { %p3183_p6 = pneg %p3182_p1 }
  0x4a   : > { %p3188_p3 = pnand %p3186_p10, %p3183_p6 }
  0x4c   : > { %3191 = shalt.err (!%p3188_p3)
}
  0x4d   : > { %s3192_s3 = scalar_lea.vmem %s3475_s28, 1024  ;;  %p3200_p12 = scmp.lt.s32.totalorder %s3475_s28, %s3475_s28 }
  0x4e   : > { %p3193_p5 = scmp.ne.s32.totalorder %s3475_s28, %s3192_s3  ;;  %p3201_p0 = scmp.lt.s32.totalorder %s3192_s3, %s3192_s3 }
  0x50   : > { %p3195_p7 = pnand %p3193_p5, %p3153_p13  ;;  %p3202_p2 = por %p3201_p0, %p3200_p12 }
  0x52   : > { %p3196_p9 = pneg %p3195_p7 }
  0x54   : > { %p3203_p1 = pnand %p3202_p2, %p3196_p9 }
  0x56   : > { %3206 = shalt.err (!%p3203_p1)
}
  0x57   : > { %3069 = dma.hbm_to_vmem [thread:$0]  (!%p3471_p11), %s4058_s11, 1024, %s3475_s28, [#allocation6], %s3311_s18, %s3311_s18, %s3312_s19  }
  0x58   : > { %s3530_s17 = sadd.s32 1, %s3307_s21   ;;  %s43_s26 = sadd.s32 1, %s3303_s20 }
  0x59   : > { %s40_s0 = ssub.s32 %s3307_s21, %s3530_s17  ;;  %p50_p13 = scmp.ne.s32.totalorder %s3303_s20, %s3299_s30 }
  0x5a   : > { %p41_p6 = scmp.eq.s32.totalorder %s40_s0, 0  ;;  %p51_p10 = scmp.eq.s32.totalorder %s3307_s21, 0 }
  0x5b   : > { %p4059_p3 = scmp.eq.s32.totalorder %s3441_s1, 1  ;;  %p3080_p7 = scmp.lt.s32.totalorder %s3307_s21, 2 }
  0x5c   : > { %s3546_s29 = scalar_select %p41_p6, %s3303_s20, %s43_s26  }
  0x5d   : > { %p3540_p5 = por %p4059_p3, %p50_p13  ;;  %p52_p9 = por %p51_p10, %p50_p13 }
  0x5e   : > { %s558_s22 = sand.u32 1, %s3303_s20   ;;  %s2609_s28 = sshll.u32 %s3307_s21, 7 }
  0x5f   : > { %s4060_s23 = scalar_select %p3540_p5, 1, 0 }
  0x60   : > { %s2608_s25 = sshll.u32 %s558_s22, 3  ;;  %s4061_s27 = sld [smem:[#allocation14_spill]] }
  0x61   : > { %s562_s15 = scalar_lea.vmem [#allocation2], %s2608_s25  ;;  %p3557_p11 = pnand %p3080_p7, %p52_p9 }
  0x62   : > { %s569_s16 = sshll.u32 %s562_s15, 4  ;;  %s559_s0 = scalar_lea.sflag [#allocation3], %s558_s22  ;;  %s3555_s16 = int_to_ptr.vmem [resolvable:$true] %s569_s16 }
  0x63   : > { %p3209_p0 = pneg %p3557_p11 }
  0x66   : > { %s3553_s3 = scalar_lea.hbm %s4061_s27, %s2609_s28  ;;  %s3212_s18 = scalar_lea.hbm %s4061_s27, 256 }
  0x67   : > { %s3207_s7 = scalar_lea.hbm %s3553_s3, 128  ;;  %p3213_p13 = scmp.lt.u32.totalorder %s3553_s3, %s4061_s27 }
  0x68   : > { %p3208_p12 = scmp.ne.s32.totalorder %s3553_s3, %s3207_s7  ;;  %p3214_p6 = scmp.lt.u32.totalorder %s3212_s18, %s3207_s7 }
  0x69   : > { %p3216_p3 = scmp.lt.u32.totalorder %s3207_s7, %s3553_s3 }
  0x6a   : > { %p3210_p2 = pnand %p3209_p0, %p3208_p12  ;;  %p3215_p10 = por %p3214_p6, %p3213_p13 }
  0x6c   : > { %p3211_p1 = pneg %p3210_p2  ;;  %p3217_p7 = por %p3216_p3, %p3215_p10 }
  0x6e   : > { %p3218_p9 = pnand %p3217_p7, %p3211_p1 }
  0x70   : > { %3221 = shalt.err (!%p3218_p9)
}
  0x71   : > { %s3222_s22 = scalar_lea.vmem %s3555_s16, 128  ;;  %s3313_s28 = smov [#allocation2]  }
  0x72   : > { %p3223_p12 = scmp.ne.s32.totalorder %s3555_s16, %s3222_s22  ;;  %s3227_s25 = sshll.u32 %s3313_s28, 4  ;;  %s3228_s25 = int_to_ptr.vmem [resolvable:$false] %s3227_s25 }
  0x73   : > { %s3229_s19 = scalar_lea.vmem %s3228_s25, 256  ;;  %p3230_p4 = scmp.lt.s32.totalorder %s3555_s16, %s3228_s25 }
  0x74   : > { %p3225_p2 = pnand %p3223_p12, %p3209_p0  ;;  %p3231_p13 = scmp.lt.s32.totalorder %s3229_s19, %s3222_s22 }
  0x76   : > { %p3226_p5 = pneg %p3225_p2  ;;  %p3232_p6 = por %p3231_p13, %p3230_p4 }
  0x78   : > { %p3233_p10 = pnand %p3232_p6, %p3226_p5 }
  0x7a   : > { %3236 = shalt.err (!%p3233_p10)
}
  0x7b   : > { %3073 = dma.hbm_to_vmem [thread:$0]  (!%p3557_p11), %s3553_s3, 128, %s3555_s16, %s559_s0  }
  0x7c   : > { %578 = sbr.rel (%p3460_p8) target bundleno = 5421 (0x152d), region = 96  ;;  %s3589_s7 = sand.u32 (!%p3460_p8), 1, %s3299_s30  }
  0x7d   : > { %s4030_s18 = sshll.u32 (!%p3460_p8), %s3589_s7, 3  ;;  %s581_s15 = scalar_lea.sflag (!%p3460_p8), [#allocation3], %s3589_s7 }
  0x7e   : > { %s584_s22 = scalar_lea.vmem (!%p3460_p8), [#allocation2], %s4030_s18  ;;  %p4063_p4 = scmp.ne.s32.totalorder (!%p3460_p8), %s4052_s2, 0 }
  0x83   : > { %3282 = dma.done.wait (%p4063_p4), %s581_s15, 128  }
  0x84   : > { %3284 = vsyncadd (%p4063_p4), %s581_s15, 4294967168  ;;  %p4064_p5 = scmp.eq.s32.totalorder %s3441_s1, 0 }
  0x86   : > { %3286 = dma.done.wait (%p4064_p5), [#allocation6], 2048   ;;  %p4065_p8 = pmov %p4064_p5 }
  0x87   : > { %v3314_v0 = vmov 0.0|0.0   ;;  %vm3315_vm0 = vmmov 0   ;;  %v3316_v1 = vmov 0.0   ;;  %s4066_s3 = sld [smem:[#allocation15_spill]]  ;;  %s4067_s24 = sld [smem:[#allocation17_spill]]  ;;  %v3628_v10 = vld [vmem:[%s584_s22] sm:$0xff]  ;;  %v648_v35 = vlaneseq }
  0x88   : > { %3288 = vsyncadd (%p4065_p8), [#allocation6], 4294965248  ;;  %2967 = vmatprep.subr.bf16.mxu1 %v3314_v0  ;;  %2787 = vmatprep.mubr.msk.f32.mxu1 %vm3315_vm0, %v3316_v1  ;;  %vm664_vm1 = vcmask 261120   ;;  %s4068_s5 = sld [smem:[#allocation19_spill]]  ;;  %s4069_s4 = sld [smem:[#allocation18_spill]]  ;;  %vm900_vm2 = vcmask 130048  }
  0x89   : > { %2979 = vmatprep.subr.bf16.mxu0 %v3314_v0  ;;  %2809 = vmatprep.mubr.msk.f32.mxu0 %vm3315_vm0, %v3316_v1  ;;  %s4070_s19 = sld [smem:[#allocation16_spill]]  ;;  %s4032_s15 = smov 112   ;;  %v3687_v36 = vshrl.u32 %v648_v35, 7  ;;  %v3689_v37 = vand.u32 127, %v648_v35  ;;  %vm979_vm4 = vcmask 64512   ;;  %vm1452_vm5 = vcmask 523264  }
  0x8a   : > { %s4071_s6 = sld [smem:[#allocation20_spill]]  ;;  %s4031_s26 = smov 16  }
  0x8b   : > { %vm652_vm3 = vcmp.le.s32.totalorder %v3689_v37, %v3687_v36  ;;  %s4072_s8 = sld [smem:[#allocation22_spill]]  ;;  %s4073_s16 = sld [smem:[#allocation24_spill]] }
  0x8c   : > { %s4075_s0 = smov 112   ;;  %s4078_s28 = sld [smem:[#allocation27_spill]] }
  0x8d   : > { %v653_v2 = vld [vmem:[%s4066_s3] sm:$0xff]  ;;  %v654_v3 = vld [vmem:[%s4066_s3 + $0x8] sm:$0xff]  ;;  %v655_v4 = vld [vmem:[%s4066_s3 + $0x10] sm:$0xff]  ;;  %s2692_s25 = sshll.u32 %s3441_s1, 7  ;;  %s4079_s18 = sshll.u32 %s3589_s7, 3 }
  0x8e   : > { %v2968_v5 = vpack.c.bf16 %v654_v3, %v653_v2  ;;  %v656_v6 = vld [vmem:[%s4066_s3 + $0x18] sm:$0xff]  ;;  %v738_v8 = vld [vmem:[%s4067_s24] sm:$0xff]  ;;  %v739_v9 = vld [vmem:[%s4067_s24 + $0x8] sm:$0xff]  ;;  %s646_s22 = scalar_lea.vmem [#allocation8], %s4079_s18  ;;  %s2501_s2 = scalar_lea.sflag [#allocation4], %s3589_s7 }
  0x8f   : > { %v2971_v7 = vpack.c.bf16 %v656_v6, %v655_v4  ;;  %v2974_v11 = vpack.c.bf16 %v739_v9, %v738_v8  ;;  %v740_v12 = vld [vmem:[%s4067_s24 + $0x10] sm:$0xff]  ;;  %v741_v13 = vld [vmem:[%s4067_s24 + $0x18] sm:$0xff]  ;;  %v819_v15 = vld [vmem:[%s4068_s5] sm:$0xff]  ;;  %p4081_p0 = scmp.ne.s32.totalorder %s4060_s23, 0  ;;  %s3319_s1 = smov [#allocation8]  }
  0x90   : > { %2969 = vmatpush3.bf16.msra.mxu1 %v2968_v5  ;;  %v2977_v14 = vpack.c.bf16 %v741_v13, %v740_v12  ;;  %v820_v16 = vld [vmem:[%s4068_s5 + $0x8] sm:$0xff]  ;;  %v821_v17 = vld [vmem:[%s4068_s5 + $0x10] sm:$0xff]  ;;  %v822_v19 = vld [vmem:[%s4068_s5 + $0x18] sm:$0xff] }
  0x91   : > { %2970 = vmatprep.subr.bf16.mxu1 %v3314_v0  ;;  %v2980_v18 = vpack.c.bf16 %v820_v16, %v819_v15  ;;  %v2983_v20 = vpack.c.bf16 %v822_v19, %v821_v17  ;;  %v2617_v23 = vld [vmem:[%s4069_s4] ss:$0 sm:$0xff]  ;;  %v1237_v3 = vld [vmem:[#allocation5] sm:$0xff]  ;;  %v1238_v4 = vld [vmem:[#allocation5 + $0x8] sm:$0xff] }
  0x92   : > { %v2615_v25 = vld [vmem:[%s4070_s19] ss:$0 sm:$0xff]  ;;  %v2986_v6 = vpack.c.bf16 %v1238_v4, %v1237_v3 }
  0x93   : > { %2981 = vmatpush3.bf16.msra.mxu0 %v2980_v18  ;;  %v2619_v29 = vld [vmem:[%s4071_s6] ss:$0 sm:$0xff] }
  0x94   : > { %2972 = vmatpush3.bf16.msra.mxu1 %v2971_v7  ;;  %2982 = vmatprep.subr.bf16.mxu0 %v3314_v0  ;;  %v1239_v5 = vld [vmem:[#allocation5 + $0x10] sm:$0xff]  ;;  %v1240_v7 = vld [vmem:[#allocation5 + $0x18] sm:$0xff] }
  0x95   : > { %2973 = vmatprep.subr.bf16.mxu1 %v3314_v0  ;;  %v2989_v8 = vpack.c.bf16 %v1240_v7, %v1239_v5  ;;  %v2627_v16 = vld [vmem:[%s4072_s8] ss:$0 sm:$0xff] }
  0x97   : > { %2788 = vmatmul.mubr.msk.f32.vlgmr.msra.gmra.mrb[0].mxu1 %vm664_vm1, %v3628_v10  ;;  %2984 = vmatpush3.bf16.msra.mxu0 %v2983_v20 }
  0x98   : > { %2975 = vmatpush3.bf16.msra.mxu1 %v2974_v11  ;;  %2798 = vmatprep.mubr.msk.f32.mxu1 %vm3315_vm0, %v3316_v1 }
  0x99   : > { %2976 = vmatprep.subr.bf16.mxu1 %v3314_v0  ;;  %2822 = vmatprep.subr.mxu0 %v3316_v1 }
  0x9a   : > { %2810 = vmatmul.mubr.msk.f32.vlgmr.msra.gmra.mrb[0].mxu0 %vm664_vm1, %v3628_v10 }
  0x9b   : > { %2824 = vmatprep.mubr.msk.f32.mxu0 %vm3315_vm0, %v3316_v1 }
  0x9c   : > { %2978 = vmatpush3.bf16.msra.mxu1 %v2977_v14 }
  0x9d   : > { %2812 = vmatprep.subr.mxu1 %v3316_v1 }
  0x9f   : > { %2799 = vmatmul.mubr.msk.f32.vlgmr.msra.gmra.mrb[2].mxu1 %vm664_vm1, %v3628_v10 }
  0xa0   : > { %2814 = vmatprep.mubr.msk.f32.mxu1 %vm3315_vm0, %v3316_v1 }
 0x16a   : > { %v734_v21 = vpop.f32.mrb[0].mxu1 }
 0x16b   : > { %v2789_v22 = vpop.f32.mrb[1].mxu1  ;;  %v735_v28 = vadd.f32 %v2615_v25, %v734_v21 }
 0x16d   : > { %v896_v30 = vpop.f32.mrb[0].mxu0 }
 0x16e   : > { %v897_v31 = vadd.f32 %v2619_v29, %v896_v30  ;;  %v2811_v32 = vpop.f32.mrb[1].mxu0  ;;  %v1354_v30 = vld [vmem:[#allocation7 + $0x10] sm:$0xff] }
 0x172   : > { %v815_v24 = vpop.f32.mrb[2].mxu1 }
 0x173   : > { %v816_v26 = vadd.f32 %v2617_v23, %v815_v24  ;;  %v2800_v27 = vpop.f32.mrb[3].mxu1 }
 0x174   : > { %v1352_v27 = vld [vmem:[#allocation7] sm:$0xff] }
 0x175   : > { %1066 = vrot.lane.b32.xlu0 %v816_v26, %s4032_s15  ;;  %2813 = vmatpush3.xpose.msk.msra.mxu1 %vm900_vm2, %v816_v26 }
 0x176   : > { %2817 = vmatprep.subr.mxu1 %v3316_v1 }
 0x178   : > { %2815 = vmatmul.mubr.msk.f32.vlgmr.msra.gmra.mrb[4].mxu1 %vm900_vm2, %v735_v28 }
 0x179   : > { %1064 = vrot.lane.b32.xlu0 %v735_v28, %s4032_s15  ;;  %2819 = vmatprep.mubr.msk.f32.mxu1 %vm3315_vm0, %v3316_v1  ;;  %v1353_v28 = vld [vmem:[#allocation7 + $0x8] sm:$0xff] }
 0x17a   : > { %2818 = vmatpush3.msra.mxu1 %v897_v31  ;;  %v2992_v29 = vpack.c.bf16 %v1353_v28, %v1352_v27  ;;  %v2644_v28 = vld [vmem:[%s4067_s24 + $0x20] sm:$0xff] }
 0x17b   : > { %2827 = vmatprep.subr.mxu1 %v3316_v1 }
 0x1e7   : > { %v1067_v33 = vpop.permute.xlu0 %1066 }
 0x1e8   : > { %2823 = vmatpush3.xpose.msk.msra.mxu0 %vm900_vm2, %v1067_v33  ;;  %v1438_v33 = vld [vmem:[%s4011_s13 + $0x8] sm:$0xff] }
 0x1e9   : > { %2985 = vmatprep.subr.bf16.mxu0 %v3314_v0 }
 0x1eb   : > { %v1065_v34 = vpop.permute.xlu0 %1064 }
 0x1ec   : > { %2825 = vmatmul.mubr.msk.f32.vlgmr.msra.gmra.mrb[2].mxu0 %vm900_vm2, %v1065_v34  ;;  %v1439_v34 = vld [vmem:[%s4011_s13 + $0x10] sm:$0xff] }
 0x1ed   : > { %2840 = vmatprep.mubr.msk.f32.mxu0 %vm3315_vm0, %v3316_v1  ;;  %2987 = vmatpush3.bf16.msra.mxu0 %v2986_v6 }
 0x1ee   : > { %2988 = vmatprep.subr.bf16.mxu0 %v3314_v0 }
 0x1f1   : > { %2990 = vmatpush3.bf16.msra.mxu0 %v2989_v8 }
 0x1f2   : > { %2997 = vmatprep.subr.bf16.mxu0 %v3314_v0 }
 0x24b   : > { %v973_v38 = vpop.f32.mrb[4].mxu1 }
 0x24c   : > { %v977_v39 = vmul.f32 0.25, %v973_v38  ;;  %v2816_v40 = vpop.f32.mrb[5].mxu1  ;;  %v1440_v38 = vld [vmem:[%s4011_s13 + $0x18] sm:$0xff] }
 0x24d   : > { %v1441_v40 = vld [vmem:[%s4011_s13 + $0x20] sm:$0xff] }
 0x24e   : > { %v978_v41 = vsel %vm652_vm3, %v977_v39, -1e+30  ;;  %v3001_v39 = vpack.c.bf16 %v1440_v38, %v1439_v34  ;;  %v2647_v34 = vld [vmem:[%s4067_s24 + $0x38] sm:$0xff]  ;;  %v2642_v38 = vld [vmem:[%s4070_s19 + $0x1] ss:$0 sm:$0xff] }
 0x24f   : > { %v980_v42 = vsel %vm979_vm4, %v978_v41, -inf }
 0x250   : > { %981 = vmax.xlane.f32.xlu1 %v980_v42 }
 0x2bf   : > { %v1138_v43 = vpop.f32.mrb[2].mxu0 }
 0x2c0   : > { %v1142_v44 = vmul.f32 0.25, %v1138_v43  ;;  %v2826_v45 = vpop.f32.mrb[3].mxu0 }
 0x2c2   : > { %v1143_v46 = vsel %vm652_vm3, %v1142_v44, -1e+30 }
 0x2c3   : > { %v1144_v47 = vsel %vm979_vm4, %v1143_v46, -inf }
 0x2c4   : > { %1145 = vmax.xlane.f32.xlu1 %v1144_v47  ;;  %v2629_v47 = vld [vmem:[%s4007_s9] ss:$0 sm:$0xff] }
 0x2dd   : > { %v982_v48 = vpop.xlane.xlu1 %981 }
 0x2de   : > { %v983_v49 = vsub.f32 %v978_v41, %v982_v48  ;;  %v1442_v41 = vld [vmem:[%s4011_s13 + $0x28] sm:$0xff] }
 0x2df   : > { %v3004_v42 = vpack.c.bf16 %v1442_v41, %v1441_v40 }
 0x2e0   : > { %v984_v50 = vmul.f32 1.442695, %v983_v49  ;;  %v2630_v49 = vld [vmem:[%s4008_s10] ss:$0 sm:$0xff] }
 0x2e2   : > { %3125 = vpow2.f32 %v984_v50 }
 0x2ec   : > { %v3126_v51 = vpop.eup %3125 }
 0x2ed   : > { %v986_v52 = vsel %vm979_vm4, %v3126_v51, 0.0 }
 0x2ee   : > { %987 = vadd.xlane.f32.xlu0 %v986_v52  ;;  %v1443_v52 = vld [vmem:[%s4011_s13 + $0x30] sm:$0xff] }
 0x351   : > { %v1146_v53 = vpop.xlane.xlu1 %1145 }
 0x352   : > { %v1147_v54 = vsub.f32 %v1143_v46, %v1146_v53  ;;  %v1444_v53 = vld [vmem:[%s4011_s13 + $0x38] sm:$0xff] }
 0x354   : > { %v1148_v55 = vmul.f32 1.442695, %v1147_v54  ;;  %v3007_v54 = vpack.c.bf16 %v1444_v53, %v1443_v52 }
 0x356   : > { %3127 = vpow2.f32 %v1148_v55  ;;  %v2631_v55 = vld [vmem:[%s4010_s12] ss:$0 sm:$0xff] }
 0x360   : > { %v3128_v56 = vpop.eup %3127 }
 0x361   : > { %v1150_v57 = vsel %vm979_vm4, %v3128_v56, 0.0 }
 0x362   : > { %1151 = vadd.xlane.f32.xlu1 %v1150_v57 }
 0x373   : > { %1156 = vrot.lane.b32.xlu1 %v897_v31, %s4032_s15  ;;  %v1355_v31 = vld [vmem:[#allocation7 + $0x18] sm:$0xff] }
 0x374   : > { %v2995_v32 = vpack.c.bf16 %v1355_v31, %v1354_v30 }
 0x37b   : > { %v988_v58 = vpop.xlane.xlu0 %987 }
 0x37c   : > { %3129 = vrcp.f32 %v988_v58 }
 0x386   : > { %v3130_v59 = vpop.eup %3129 }
 0x387   : > { %v990_v60 = vmul.f32 %v3130_v59, %v3126_v51 }
 0x389   : > { %2820 = vmatmul.mubr.msk.f32.vlgmr.msra.gmra.mrb[6].mxu1 %vm979_vm4, %v990_v60  ;;  %v2633_v60 = vld [vmem:[%s4012_s14] ss:$0 sm:$0xff] }
 0x38a   : > { %2829 = vmatprep.mubr.msk.f32.mxu1 %vm3315_vm0, %v3316_v1 }
 0x3ef   : > { %v1152_v61 = vpop.xlane.xlu1 %1151 }
 0x3f0   : > { %3131 = vrcp.f32 %v1152_v61 }
 0x3f3   : > { %v1157_v62 = vpop.permute.xlu1 %1156 }
 0x3f4   : > { %2828 = vmatpush3.msra.mxu1 %v1157_v62 }
 0x3f5   : > { %2991 = vmatprep.subr.bf16.mxu1 %v3314_v0 }
 0x3fa   : > { %v3132_v63 = vpop.eup %3131 }
 0x3fb   : > { %v1154_v2 = vmul.f32 %v3132_v63, %v3128_v56 }
 0x3fd   : > { %2830 = vmatmul.mubr.msk.f32.vlgmr.msra.gmra.mrb[8].mxu1 %vm979_vm4, %v1154_v2 }
 0x3fe   : > { %2851 = vmatprep.mubr.msk.f32.mxu1 %vm3315_vm0, %v3316_v1  ;;  %2993 = vmatpush3.bf16.msra.mxu1 %v2992_v29  ;;  %v2645_v29 = vld [vmem:[%s4067_s24 + $0x28] sm:$0xff] }
 0x3ff   : > { %2994 = vmatprep.subr.bf16.mxu1 %v3314_v0 }
 0x402   : > { %2996 = vmatpush3.bf16.msra.mxu1 %v2995_v32  ;;  %v3016_v32 = vpack.c.bf16 %v2645_v29, %v2644_v28  ;;  %v2665_v28 = vld [vmem:[%s4072_s8 + $0x1] ss:$0 sm:$0xff] }
 0x403   : > { %3009 = vmatprep.subr.bf16.mxu1 %v3314_v0 }
 0x45c   : > { %v1060_v9 = vpop.f32.mrb[6].mxu1 }
 0x45d   : > { %v2821_v11 = vpop.f32.mrb[7].mxu1 }
 0x45e   : > { %v2638_v11 = vld [vmem:[%s4066_s3 + $0x28] sm:$0xff] }
 0x4d0   : > { %v1228_v12 = vpop.f32.mrb[8].mxu1 }
 0x4d1   : > { %1233 = vrot.lane.b32.xlu1 %v1228_v12, %s4031_s26  ;;  %v2831_v13 = vpop.f32.mrb[9].mxu1  ;;  %s4076_s26 = smov 16  }
 0x4d2   : > { %v2651_v13 = vld [vmem:[%s4068_s5 + $0x20] sm:$0xff] }
 0x543   : > { %v1234_v14 = vpop.permute.xlu1 %1233 }
 0x544   : > { %v1236_v15 = vsel %vm900_vm2, %v1060_v9, %v1234_v14  ;;  %v2637_v9 = vld [vmem:[%s4066_s3 + $0x20] sm:$0xff]  ;;  %v2652_v14 = vld [vmem:[%s4068_s5 + $0x28] sm:$0xff] }
 0x545   : > { %2841 = vmatmul.mubr.msk.f32.vlgmr.msra.gmra.mrb[4].mxu0 %vm664_vm1, %v1236_v15  ;;  %v3010_v12 = vpack.c.bf16 %v2638_v11, %v2637_v9  ;;  %v3022_v15 = vpack.c.bf16 %v2652_v14, %v2651_v13 }
 0x546   : > { %2870 = vmatprep.mubr.msk.f32.mxu0 %vm3315_vm0, %v3316_v1 }
 0x618   : > { %v1317_v17 = vpop.f32.mrb[4].mxu0 }
 0x619   : > { %v1318_v18 = vadd.f32 %v2627_v16, %v1317_v17  ;;  %v2842_v19 = vpop.f32.mrb[5].mxu0  ;;  %v2639_v16 = vld [vmem:[%s4066_s3 + $0x30] sm:$0xff]  ;;  %v2640_v17 = vld [vmem:[%s4066_s3 + $0x38] sm:$0xff]  ;;  %s4074_s3 = sld [smem:[#allocation25_spill]] }
 0x61a   : > { %v2653_v19 = vld [vmem:[%s4068_s5 + $0x30] sm:$0xff] }
 0x61b   : > { %v1321_v20 = vadd.f32 %v1318_v18, %v3628_v10  ;;  %v1437_v10 = vld [vmem:[%s4011_s13] sm:$0xff]  ;;  %v3013_v18 = vpack.c.bf16 %v2640_v17, %v2639_v16  ;;  %v2144_v16 = vld [vmem:[#allocation5 + $0x20] sm:$0xff]  ;;  %v2145_v17 = vld [vmem:[#allocation5 + $0x28] sm:$0xff] }
 0x61c   : > { %v2998_v35 = vpack.c.bf16 %v1438_v33, %v1437_v10  ;;  %v2646_v33 = vld [vmem:[%s4067_s24 + $0x30] sm:$0xff] }
 0x61d   : > { %v1324_v21 = vsel %vm664_vm1, %v1321_v20, 0.0 }
 0x61e   : > { %1325 = vadd.xlane.f32.xlu1 %v1324_v21  ;;  %2999 = vmatpush3.bf16.msra.mxu0 %v2998_v35  ;;  %v3019_v35 = vpack.c.bf16 %v2647_v34, %v2646_v33 }
 0x61f   : > { %3000 = vmatprep.subr.bf16.mxu0 %v3314_v0  ;;  %v2636_v30 = vld [vmem:[%s4074_s3] ss:$0 sm:$0xff] }
 0x622   : > { %3002 = vmatpush3.bf16.msra.mxu0 %v3001_v39 }
 0x623   : > { %3003 = vmatprep.subr.bf16.mxu0 %v3314_v0 }
 0x626   : > { %3005 = vmatpush3.bf16.msra.mxu0 %v3004_v42 }
 0x627   : > { %3006 = vmatprep.subr.bf16.mxu0 %v3314_v0 }
 0x62a   : > { %3008 = vmatpush3.bf16.msra.mxu0 %v3007_v54 }
 0x62b   : > { %3021 = vmatprep.subr.bf16.mxu0 %v3314_v0 }
 0x6ab   : > { %v1326_v22 = vpop.xlane.xlu1 %1325 }
 0x6ac   : > { %v1328_v23 = vmul.f32 0.03125, %v1326_v22 }
 0x6ae   : > { %v1329_v24 = vsub.f32 %v1321_v20, %v1328_v23  ;;  %v2654_v20 = vld [vmem:[%s4068_s5 + $0x38] sm:$0xff]  ;;  %s4077_s5 = sld [smem:[#allocation26_spill]] }
 0x6af   : > { %v3025_v21 = vpack.c.bf16 %v2654_v20, %v2653_v19  ;;  %v3028_v19 = vpack.c.bf16 %v2145_v17, %v2144_v16  ;;  %v2147_v20 = vld [vmem:[#allocation5 + $0x38] sm:$0xff] }
 0x6b0   : > { %v1330_v25 = vmul.f32 %v1329_v24, %v1329_v24 }
 0x6b2   : > { %v1331_v26 = vsel %vm664_vm1, %v1330_v25, 0.0 }
 0x6b3   : > { %1332 = vadd.xlane.f32.xlu0 %v1331_v26  ;;  %v2635_v26 = vld [vmem:[%s4073_s16] ss:$0 sm:$0xff] }
 0x740   : > { %v1333_v43 = vpop.xlane.xlu0 %1332 }
 0x741   : > { %v1334_v44 = vmul.f32 0.03125, %v1333_v43 }
 0x743   : > { %v1335_v45 = vadd.f32 1e-05, %v1334_v44  ;;  %v2649_v44 = vld [vmem:[%s4069_s4 + $0x1] ss:$0 sm:$0xff] }
 0x745   : > { %3133 = vrsqrt.f32 %v1335_v45 }
 0x74f   : > { %v3134_v46 = vpop.eup %3133 }
 0x750   : > { %v1337_v48 = vmul.f32 %v3134_v46, %v1329_v24 }
 0x752   : > { %v1344_v50 = vmul.f32 %v2629_v47, %v1337_v48  ;;  %v2656_v48 = vld [vmem:[%s4071_s6 + $0x1] ss:$0 sm:$0xff]  ;;  %s4080_s6 = sld [smem:[#allocation28_spill]] }
 0x754   : > { %v1351_v51 = vadd.f32 %v2630_v49, %v1344_v50 }
 0x756   : > { %2852 = vmatmul.mubr.msk.f32.vlgmr.msra.gmra.mrb[10].mxu1 %vm664_vm1, %v1351_v51 }
 0x757   : > { %2881 = vmatprep.mubr.msk.f32.mxu1 %vm3315_vm0, %v3316_v1  ;;  %3011 = vmatpush3.bf16.msra.mxu1 %v3010_v12 }
 0x758   : > { %3012 = vmatprep.subr.bf16.mxu1 %v3314_v0  ;;  %s3953_s8 = scalar_lea.hbm %s4080_s6, %s2692_s25 }
 0x75b   : > { %3014 = vmatpush3.bf16.msra.mxu1 %v3013_v18  ;;  %v2146_v18 = vld [vmem:[#allocation5 + $0x30] sm:$0xff] }
 0x75c   : > { %3015 = vmatprep.subr.bf16.mxu1 %v3314_v0 }
 0x829   : > { %v1432_v56 = vpop.f32.mrb[10].mxu1 }
 0x82a   : > { %v1433_v57 = vadd.f32 %v2631_v55, %v1432_v56  ;;  %v2853_v58 = vpop.f32.mrb[11].mxu1 }
 0x82c   : > { %v1436_v59 = vmax.f32 %v1433_v57, 0.0 }
 0x82e   : > { %2871 = vmatmul.mubr.msk.f32.vlgmr.msra.gmra.mrb[6].mxu0 %vm1452_vm5, %v1436_v59 }
 0x82f   : > { %2903 = vmatprep.mubr.msk.f32.mxu0 %vm3315_vm0, %v3316_v1  ;;  %3023 = vmatpush3.bf16.msra.mxu0 %v3022_v15 }
 0x830   : > { %3024 = vmatprep.subr.bf16.mxu0 %v3314_v0 }
 0x833   : > { %3026 = vmatpush3.bf16.msra.mxu0 %v3025_v21  ;;  %v3031_v21 = vpack.c.bf16 %v2147_v20, %v2146_v18 }
 0x834   : > { %2916 = vmatprep.subr.mxu0 %v3316_v1 }
 0x901   : > { %v1522_v61 = vpop.f32.mrb[6].mxu0 }
 0x902   : > { %v1523_v62 = vadd.f32 %v2633_v60, %v1522_v61  ;;  %v2872_v63 = vpop.f32.mrb[7].mxu0 }
 0x904   : > { %v1526_v2 = vadd.f32 %v1523_v62, %v1351_v51 }
 0x906   : > { %v1529_v3 = vsel %vm664_vm1, %v1526_v2, 0.0 }
 0x907   : > { %1530 = vadd.xlane.f32.xlu0 %v1529_v3 }
 0x994   : > { %v1531_v4 = vpop.xlane.xlu0 %1530 }
 0x995   : > { %v1532_v5 = vmul.f32 0.03125, %v1531_v4 }
 0x997   : > { %v1533_v6 = vsub.f32 %v1526_v2, %v1532_v5 }
 0x999   : > { %v1534_v7 = vmul.f32 %v1533_v6, %v1533_v6 }
 0x99b   : > { %v1535_v8 = vsel %vm664_vm1, %v1534_v7, 0.0 }
 0x99c   : > { %1536 = vadd.xlane.f32.xlu0 %v1535_v8 }
 0xa29   : > { %v1537_v22 = vpop.xlane.xlu0 %1536 }
 0xa2a   : > { %v1538_v23 = vmul.f32 0.03125, %v1537_v22 }
 0xa2c   : > { %v1539_v24 = vadd.f32 1e-05, %v1538_v23 }
 0xa2e   : > { %3135 = vrsqrt.f32 %v1539_v24 }
 0xa38   : > { %v3136_v25 = vpop.eup %3135 }
 0xa39   : > { %v1541_v27 = vmul.f32 %v3136_v25, %v1533_v6 }
 0xa3b   : > { %v1548_v31 = vmul.f32 %v2635_v26, %v1541_v27 }
 0xa3d   : > { %v3814_v10 = vadd.f32 %v2636_v30, %v1548_v31 }
 0xa3f   : > { %2882 = vmatmul.mubr.msk.f32.vlgmr.msra.gmra.mrb[12].mxu1 %vm664_vm1, %v3814_v10  ;;  %2904 = vmatmul.mubr.msk.f32.vlgmr.msra.gmra.mrb[8].mxu0 %vm664_vm1, %v3814_v10 }
 0xa40   : > { %3017 = vmatpush3.bf16.msra.mxu1 %v3016_v32  ;;  %2892 = vmatprep.mubr.msk.f32.mxu1 %vm3315_vm0, %v3316_v1 }
 0xa41   : > { %3018 = vmatprep.subr.bf16.mxu1 %v3314_v0  ;;  %2918 = vmatprep.mubr.msk.f32.mxu0 %vm3315_vm0, %v3316_v1 }
 0xa44   : > { %3020 = vmatpush3.bf16.msra.mxu1 %v3019_v35 }
 0xa45   : > { %2906 = vmatprep.subr.mxu1 %v3316_v1 }
 0xa47   : > { %2893 = vmatmul.mubr.msk.f32.vlgmr.msra.gmra.mrb[14].mxu1 %vm664_vm1, %v3814_v10 }
 0xa48   : > { %2908 = vmatprep.mubr.msk.f32.mxu1 %vm3315_vm0, %v3316_v1 }
 0xb12   : > { %v1638_v39 = vpop.f32.mrb[12].mxu1  ;;  %v1804_v40 = vpop.f32.mrb[8].mxu0 }
 0xb13   : > { %v1639_v41 = vadd.f32 %v2642_v38, %v1638_v39  ;;  %v2883_v42 = vpop.f32.mrb[13].mxu1  ;;  %v2905_v43 = vpop.f32.mrb[9].mxu0  ;;  %v1805_v49 = vadd.f32 %v2656_v48, %v1804_v40 }
 0xb14   : > { %v2264_v43 = vld [vmem:[#allocation7 + $0x30] sm:$0xff] }
 0xb15   : > { %1970 = vrot.lane.b32.xlu1 %v1639_v41, %s4075_s0 }
 0xb1a   : > { %v1721_v45 = vpop.f32.mrb[14].mxu1 }
 0xb1b   : > { %v1722_v46 = vadd.f32 %v2649_v44, %v1721_v45  ;;  %v2894_v47 = vpop.f32.mrb[15].mxu1  ;;  %v2265_v44 = vld [vmem:[#allocation7 + $0x38] sm:$0xff] }
 0xb1c   : > { %v3037_v45 = vpack.c.bf16 %v2265_v44, %v2264_v43  ;;  %v2676_v47 = vld [vmem:[%s4011_s13 + $0x50] sm:$0xff] }
 0xb1d   : > { %1972 = vrot.lane.b32.xlu0 %v1722_v46, %s4075_s0  ;;  %2907 = vmatpush3.xpose.msk.msra.mxu1 %vm900_vm2, %v1722_v46  ;;  %v2675_v46 = vld [vmem:[%s4011_s13 + $0x48] sm:$0xff] }
 0xb1e   : > { %2911 = vmatprep.subr.mxu1 %v3316_v1 }
 0xb20   : > { %2909 = vmatmul.mubr.msk.f32.vlgmr.msra.gmra.mrb[16].mxu1 %vm900_vm2, %v1639_v41  ;;  %v2263_v41 = vld [vmem:[#allocation7 + $0x28] sm:$0xff] }
 0xb21   : > { %2912 = vmatpush3.msra.mxu1 %v1805_v49  ;;  %2913 = vmatprep.mubr.msk.f32.mxu1 %vm3315_vm0, %v3316_v1 }
 0xb22   : > { %2921 = vmatprep.subr.mxu1 %v3316_v1 }
 0xb87   : > { %v1971_v51 = vpop.permute.xlu1 %1970 }
 0xb8f   : > { %v1973_v50 = vpop.permute.xlu0 %1972 }
 0xb90   : > { %2917 = vmatpush3.xpose.msk.msra.mxu0 %vm900_vm2, %v1973_v50 }
 0xb91   : > { %3027 = vmatprep.subr.bf16.mxu0 %v3314_v0 }
 0xb93   : > { %2919 = vmatmul.mubr.msk.f32.vlgmr.msra.gmra.mrb[10].mxu0 %vm900_vm2, %v1971_v51  ;;  %v2678_v51 = vld [vmem:[%s4011_s13 + $0x60] sm:$0xff] }
 0xb94   : > { %2934 = vmatprep.mubr.msk.f32.mxu0 %vm3315_vm0, %v3316_v1  ;;  %3029 = vmatpush3.bf16.msra.mxu0 %v3028_v19 }
 0xb95   : > { %3030 = vmatprep.subr.bf16.mxu0 %v3314_v0 }
 0xb98   : > { %3032 = vmatpush3.bf16.msra.mxu0 %v3031_v21 }
 0xb99   : > { %3039 = vmatprep.subr.bf16.mxu0 %v3314_v0 }
 0xbf3   : > { %v1880_v52 = vpop.f32.mrb[16].mxu1 }
 0xbf4   : > { %v1884_v53 = vmul.f32 0.25, %v1880_v52  ;;  %v2910_v54 = vpop.f32.mrb[17].mxu1  ;;  %v2679_v52 = vld [vmem:[%s4011_s13 + $0x68] sm:$0xff] }
 0xbf6   : > { %v1885_v55 = vsel %vm652_vm3, %v1884_v53, -1e+30  ;;  %v3046_v53 = vpack.c.bf16 %v2679_v52, %v2678_v51 }
 0xbf7   : > { %v1886_v56 = vsel %vm979_vm4, %v1885_v55, -inf }
 0xbf8   : > { %1887 = vmax.xlane.f32.xlu0 %v1886_v56 }
 0xc66   : > { %v2044_v57 = vpop.f32.mrb[10].mxu0 }
 0xc67   : > { %v2048_v58 = vmul.f32 0.25, %v2044_v57  ;;  %v2920_v59 = vpop.f32.mrb[11].mxu0 }
 0xc69   : > { %v2049_v60 = vsel %vm652_vm3, %v2048_v58, -1e+30  ;;  %v2669_v58 = vld [vmem:[%s4007_s9 + $0x1] ss:$0 sm:$0xff] }
 0xc6a   : > { %v2050_v61 = vsel %vm979_vm4, %v2049_v60, -inf }
 0xc6b   : > { %2051 = vmax.xlane.f32.xlu1 %v2050_v61 }
 0xc85   : > { %v1888_v62 = vpop.xlane.xlu0 %1887 }
 0xc86   : > { %v1889_v63 = vsub.f32 %v1885_v55, %v1888_v62 }
 0xc88   : > { %v1890_v2 = vmul.f32 1.442695, %v1889_v63  ;;  %v2681_v63 = vld [vmem:[%s4011_s13 + $0x78] sm:$0xff] }
 0xc8a   : > { %3137 = vpow2.f32 %v1890_v2 }
 0xc94   : > { %v3138_v3 = vpop.eup %3137 }
 0xc95   : > { %v1892_v4 = vsel %vm979_vm4, %v3138_v3, 0.0 }
 0xc96   : > { %1893 = vadd.xlane.f32.xlu0 %v1892_v4 }
 0xcf8   : > { %v2052_v5 = vpop.xlane.xlu1 %2051 }
 0xcf9   : > { %v2053_v6 = vsub.f32 %v2049_v60, %v2052_v5  ;;  %v2670_v60 = vld [vmem:[%s4008_s10 + $0x1] ss:$0 sm:$0xff] }
 0xcfb   : > { %v2054_v7 = vmul.f32 1.442695, %v2053_v6 }
 0xcfd   : > { %3139 = vpow2.f32 %v2054_v7 }
 0xd07   : > { %v3140_v8 = vpop.eup %3139 }
 0xd08   : > { %v2056_v9 = vsel %vm979_vm4, %v3140_v8, 0.0 }
 0xd09   : > { %2057 = vadd.xlane.f32.xlu0 %v2056_v9 }
 0xd1f   : > { %2062 = vrot.lane.b32.xlu0 %v1805_v49, %s4075_s0  ;;  %v2677_v49 = vld [vmem:[%s4011_s13 + $0x58] sm:$0xff] }
 0xd20   : > { %v3043_v50 = vpack.c.bf16 %v2677_v49, %v2676_v47 }
 0xd23   : > { %v1894_v36 = vpop.xlane.xlu0 %1893 }
 0xd24   : > { %3141 = vrcp.f32 %v1894_v36 }
 0xd2e   : > { %v3142_v37 = vpop.eup %3141 }
 0xd2f   : > { %v1896_v11 = vmul.f32 %v3142_v37, %v3138_v3  ;;  %v2672_v3 = vld [vmem:[%s4010_s12 + $0x1] ss:$0 sm:$0xff] }
 0xd31   : > { %2914 = vmatmul.mubr.msk.f32.vlgmr.msra.gmra.mrb[18].mxu1 %vm979_vm4, %v1896_v11 }
 0xd32   : > { %2923 = vmatprep.mubr.msk.f32.mxu1 %vm3315_vm0, %v3316_v1 }
 0xd96   : > { %v2058_v12 = vpop.xlane.xlu0 %2057 }
 0xd97   : > { %3143 = vrcp.f32 %v2058_v12 }
 0xd9a   : > { %v2063_v13 = vpop.permute.xlu0 %2062 }
 0xd9b   : > { %2922 = vmatpush3.msra.mxu1 %v2063_v13 }
 0xd9c   : > { %3033 = vmatprep.subr.bf16.mxu1 %v3314_v0 }
 0xda1   : > { %v3144_v14 = vpop.eup %3143 }
 0xda2   : > { %v2060_v15 = vmul.f32 %v3144_v14, %v3140_v8  ;;  %v2683_v8 = vld [vmem:[%s4012_s14 + $0x1] ss:$0 sm:$0xff] }
 0xda4   : > { %2924 = vmatmul.mubr.msk.f32.vlgmr.msra.gmra.mrb[20].mxu1 %vm979_vm4, %v2060_v15 }
 0xda5   : > { %2945 = vmatprep.mubr.msk.f32.mxu1 %vm3315_vm0, %v3316_v1 }
 0xe04   : > { %v1966_v22 = vpop.f32.mrb[18].mxu1 }
 0xe05   : > { %v2915_v23 = vpop.f32.mrb[19].mxu1 }
 0xe77   : > { %v2134_v24 = vpop.f32.mrb[20].mxu1 }
 0xe78   : > { %2139 = vrot.lane.b32.xlu1 %v2134_v24, %s4076_s26  ;;  %v2925_v25 = vpop.f32.mrb[21].mxu1  ;;  %v2688_v24 = vld [vmem:[%s4074_s3 + $0x1] ss:$0 sm:$0xff]  ;;  %s2514_s26 = sshll.u32 %s646_s22, 4  ;;  %s3955_s26 = int_to_ptr.vmem [resolvable:$true] %s2514_s26 }
 0xe79   : > { %s3237_s15 = scalar_lea.vmem %s3955_s26, 128 }
 0xe7a   : > { %p3238_p11 = scmp.ne.s32.totalorder %s3955_s26, %s3237_s15 }
 0xe7c   : > { %p3239_p1 = pnand %p3238_p11, %p4081_p0 }
 0xe7e   : > { %p3240_p3 = pneg %p3239_p1 }
 0xeea   : > { %v2140_v26 = vpop.permute.xlu1 %2139 }
 0xeeb   : > { %v2142_v27 = vsel %vm900_vm2, %v1966_v22, %v2140_v26  ;;  %v2687_v22 = vld [vmem:[%s4073_s16 + $0x1] ss:$0 sm:$0xff] }
 0xeec   : > { %2935 = vmatmul.mubr.msk.f32.vlgmr.msra.gmra.mrb[12].mxu0 %vm664_vm1, %v2142_v27 }
 0xeed   : > { %2964 = vmatprep.mubr.msk.f32.mxu0 %vm3315_vm0, %v3316_v1  ;;  %v2262_v1 = vld [vmem:[#allocation7 + $0x20] sm:$0xff] }
 0xeee   : > { %v3034_v42 = vpack.c.bf16 %v2263_v41, %v2262_v1  ;;  %v2690_v1 = vld [vmem:[%s4078_s28] ss:$0 sm:$0xff] }
 0xef0   : > { %3035 = vmatpush3.bf16.msra.mxu1 %v3034_v42 }
 0xef1   : > { %3036 = vmatprep.subr.bf16.mxu1 %v3314_v0 }
 0xef4   : > { %3038 = vmatpush3.bf16.msra.mxu1 %v3037_v45 }
 0xfbf   : > { %v2225_v29 = vpop.f32.mrb[12].mxu0 }
 0xfc0   : > { %v2226_v30 = vadd.f32 %v2665_v28, %v2225_v29  ;;  %v2936_v31 = vpop.f32.mrb[13].mxu0 }
 0xfc2   : > { %v2229_v32 = vadd.f32 %v2226_v30, %v3814_v10  ;;  %v2674_v10 = vld [vmem:[%s4011_s13 + $0x40] sm:$0xff] }
 0xfc3   : > { %v3040_v48 = vpack.c.bf16 %v2675_v46, %v2674_v10 }
 0xfc4   : > { %v2234_v33 = vsel %vm664_vm1, %v2229_v32, 0.0 }
 0xfc5   : > { %2235 = vadd.xlane.f32.xlu0 %v2234_v33  ;;  %3041 = vmatpush3.bf16.msra.mxu0 %v3040_v48 }
 0xfc6   : > { %3042 = vmatprep.subr.bf16.mxu0 %v3314_v0 }
 0xfc9   : > { %3044 = vmatpush3.bf16.msra.mxu0 %v3043_v50 }
 0xfca   : > { %3045 = vmatprep.subr.bf16.mxu0 %v3314_v0 }
 0xfcd   : > { %3047 = vmatpush3.bf16.msra.mxu0 %v3046_v53 }
 0xfce   : > { %3048 = vmatprep.subr.bf16.mxu0 %v3314_v0  ;;  %v2680_v0 = vld [vmem:[%s4011_s13 + $0x70] sm:$0xff] }
 0xfcf   : > { %v3049_v2 = vpack.c.bf16 %v2681_v63, %v2680_v0 }
 0xfd1   : > { %3050 = vmatpush3.bf16.msra.mxu0 %v3049_v2 }
0x1052   : > { %v2236_v34 = vpop.xlane.xlu0 %2235 }
0x1053   : > { %v2237_v35 = vmul.f32 0.03125, %v2236_v34 }
0x1055   : > { %v2238_v38 = vsub.f32 %v2229_v32, %v2237_v35 }
0x1057   : > { %v2239_v39 = vmul.f32 %v2238_v38, %v2238_v38 }
0x1059   : > { %v2240_v40 = vsel %vm664_vm1, %v2239_v39, 0.0  ;;  %v2689_v39 = vld [vmem:[%s4077_s5] ss:$0 sm:$0xff]  ;;  %s3241_s5 = sshll.u32 %s3319_s1, 4  ;;  %s3242_s5 = int_to_ptr.vmem [resolvable:$false] %s3241_s5 }
0x105a   : > { %2241 = vadd.xlane.f32.xlu1 %v2240_v40  ;;  %s3243_s11 = scalar_lea.vmem %s3242_s5, 256  ;;  %p3244_p7 = scmp.lt.s32.totalorder %s3955_s26, %s3242_s5 }
0x105b   : > { %p3245_p9 = scmp.lt.s32.totalorder %s3243_s11, %s3237_s15 }
0x105d   : > { %p3246_p12 = por %p3245_p9, %p3244_p7 }
0x105f   : > { %p3247_p2 = pnand %p3246_p12, %p3240_p3 }
0x10e7   : > { %v2242_v54 = vpop.xlane.xlu1 %2241 }
0x10e8   : > { %v2243_v55 = vmul.f32 0.03125, %v2242_v54 }
0x10ea   : > { %v2244_v56 = vadd.f32 1e-05, %v2243_v55 }
0x10ec   : > { %3145 = vrsqrt.f32 %v2244_v56 }
0x10f6   : > { %v3146_v57 = vpop.eup %3145 }
0x10f7   : > { %v2246_v59 = vmul.f32 %v3146_v57, %v2238_v38 }
0x10f9   : > { %v2253_v61 = vmul.f32 %v2669_v58, %v2246_v59 }
0x10fb   : > { %v2260_v62 = vadd.f32 %v2670_v60, %v2253_v61 }
0x10fd   : > { %2946 = vmatmul.mubr.msk.f32.vlgmr.msra.gmra.mrb[22].mxu1 %vm664_vm1, %v2260_v62 }
0x11d0   : > { %v2343_v4 = vpop.f32.mrb[22].mxu1 }
0x11d1   : > { %v2344_v5 = vadd.f32 %v2672_v3, %v2343_v4  ;;  %v2947_v6 = vpop.f32.mrb[23].mxu1 }
0x11d3   : > { %v2347_v7 = vmax.f32 %v2344_v5, 0.0 }
0x11d5   : > { %2965 = vmatmul.mubr.msk.f32.vlgmr.msra.gmra.mrb[14].mxu0 %vm1452_vm5, %v2347_v7 }
0x12a8   : > { %v2434_v9 = vpop.f32.mrb[14].mxu0 }
0x12a9   : > { %v2435_v36 = vadd.f32 %v2683_v8, %v2434_v9  ;;  %v2966_v37 = vpop.f32.mrb[15].mxu0 }
0x12ab   : > { %v2438_v11 = vadd.f32 %v2435_v36, %v2260_v62 }
0x12ad   : > { %v2443_v12 = vsel %vm664_vm1, %v2438_v11, 0.0 }
0x12ae   : > { %2444 = vadd.xlane.f32.xlu0 %v2443_v12 }
0x133b   : > { %v2445_v13 = vpop.xlane.xlu0 %2444 }
0x133c   : > { %v2446_v14 = vmul.f32 0.03125, %v2445_v13 }
0x133e   : > { %v2447_v15 = vsub.f32 %v2438_v11, %v2446_v14 }
0x1340   : > { %v2448_v16 = vmul.f32 %v2447_v15, %v2447_v15 }
0x1342   : > { %v2449_v17 = vsel %vm664_vm1, %v2448_v16, 0.0 }
0x1343   : > { %2450 = vadd.xlane.f32.xlu0 %v2449_v17 }
0x13d0   : > { %v2451_v18 = vpop.xlane.xlu0 %2450 }
0x13d1   : > { %v2452_v19 = vmul.f32 0.03125, %v2451_v18 }
0x13d3   : > { %v2453_v20 = vadd.f32 1e-05, %v2452_v19 }
0x13d5   : > { %3147 = vrsqrt.f32 %v2453_v20 }
0x13df   : > { %v3148_v21 = vpop.eup %3147 }
0x13e0   : > { %v2455_v23 = vmul.f32 %v3148_v21, %v2447_v15 }
0x13e2   : > { %v2462_v25 = vmul.f32 %v2687_v22, %v2455_v23 }
0x13e4   : > { %v2469_v26 = vadd.f32 %v2688_v24, %v2462_v25 }
0x13e6   : > { %v2472_v27 = vsel %vm664_vm1, %v2469_v26, 0.0 }
0x13e7   : > { %2473 = vadd.xlane.f32.xlu0 %v2472_v27 }
0x1474   : > { %v2474_v28 = vpop.xlane.xlu0 %2473 }
0x1475   : > { %v2475_v29 = vmul.f32 0.03125, %v2474_v28 }
0x1477   : > { %v2476_v30 = vsub.f32 %v2469_v26, %v2475_v29 }
0x1479   : > { %v2477_v31 = vmul.f32 %v2476_v30, %v2476_v30 }
0x147b   : > { %v2478_v32 = vsel %vm664_vm1, %v2477_v31, 0.0 }
0x147c   : > { %2479 = vadd.xlane.f32.xlu1 %v2478_v32 }
0x1509   : > { %v2480_v33 = vpop.xlane.xlu1 %2479 }
0x150a   : > { %v2481_v34 = vmul.f32 0.03125, %v2480_v33 }
0x150c   : > { %v2482_v35 = vadd.f32 1e-05, %v2481_v34 }
0x150e   : > { %3149 = vrsqrt.f32 %v2482_v35 }
0x1518   : > { %v3150_v38 = vpop.eup %3149 }
0x1519   : > { %v2484_v40 = vmul.f32 %v3150_v38, %v2476_v30 }
0x151b   : > { %v2491_v41 = vmul.f32 %v2689_v39, %v2484_v40 }
0x151d   : > { %v2498_v42 = vadd.f32 %v2690_v1, %v2491_v41 }
0x151f   : > { %2499 = vst.msk [vmem:[%s646_s22] sm:$0xff] %vm664_vm1, %v2498_v42 }
0x1520   : > { %3250 = shalt.err (!%p3247_p2)
}
0x1521   : > { %s3251_s4 = scalar_lea.hbm %s3953_s8, 128  ;;  %s3255_s0 = scalar_lea.hbm %s4080_s6, 256 }
0x1522   : > { %p3252_p13 = scmp.ne.s32.totalorder %s3953_s8, %s3251_s4  ;;  %p3256_p4 = scmp.lt.u32.totalorder %s3953_s8, %s4080_s6 }
0x1523   : > { %p3257_p5 = scmp.lt.u32.totalorder %s3255_s0, %s3251_s4  ;;  %p3259_p11 = scmp.lt.u32.totalorder %s3251_s4, %s3953_s8 }
0x1524   : > { %p3253_p6 = pnand %p3252_p13, %p4081_p0 }
0x1525   : > { %p3258_p8 = por %p3257_p5, %p3256_p4 }
0x1526   : > { %p3254_p10 = pneg %p3253_p6 }
0x1527   : > { %p3260_p1 = por %p3259_p11, %p3258_p8 }
0x1529   : > { %p3261_p3 = pnand %p3260_p1, %p3254_p10 }
0x152b   : > { %3264 = shalt.err (!%p3261_p3)
}
0x152c   : > { %3061 = dma.vmem_to_hbm [thread:$0]  (%p4081_p0), %s3955_s26, 128, %s3953_s8, %s2501_s2  }
0x152d PF: > { %s4082_s18 = sld [smem:[#allocation12_spill]]  ;;  %s4083_s22 = sld [smem:[#allocation13_spill]] }
0x152e   : > { %p4085_p9 = scmp.ge.s32.totalorder %s3307_s21, 2 }
0x1533   : > { %s2526_s15 = sand.u32 1, %s4082_s18   ;;  %p4084_p7 = scmp.ne.s32.totalorder %s4083_s22, 0 }
0x1534   : > { %s2527_s1 = scalar_lea.sflag [#allocation4], %s2526_s15 }
0x1535   : > { %p3075_p12 = pnand %p4085_p9, %p4084_p7 }
0x1537   : > { %3290 = dma.done.wait (!%p3075_p12), %s2527_s1, 128  }
0x1538   : > { %3292 = vsyncadd (!%p3075_p12), %s2527_s1, 4294967168  ;;  %p33_p2 = scmp.ge.s32.totalorder %s3530_s17, 4   ;;  %s4086_s0 = smov %s3299_s30 }
0x1539   : > { %s4087_s30 = smov %s3303_s20  ;;  %s4088_s20 = smov %s3546_s29 }
0x153a   : > { %s4089_s21 = smov %s3530_s17  ;;  %35 = sbr.rel (!%p33_p2) target bundleno = 22 (0x16), region = 165 }
0x1541   :  { %2532 = vsyncpa [#allocation3], 1 }
0x1542   :  { %2534 = vsyncpa [#allocation3 + $0x1], 1 }
0x1543   :  { %2535 = vsyncpa [#allocation6], 1 }
0x1544   :  { %2536 = vsyncpa [#allocation4], 1 }
0x1545   :  { %2538 = vsyncpa [#allocation4 + $0x1], 1 }

</bundles_post_ra>
